<compile_context>
chip_gen: v7x
topology: tpu7x:2x2x1
jax: 0.10.0
libtpu: 0.0.40
codegen_flags: <defaults>
</compile_context>

<pallas_src>
import functools

import jax
import jax.numpy as jnp
from jax.experimental import pallas as pl
from jax.experimental.pallas import tpu as pltpu

# ----------------------------- config ---------------------------------------
CFG = dict(
    vocab=64,
    hidden=32,
    heads=4,
    intermediate=64,
    layers=2,
    max_pos=16,
    type_vocab=2,
    ln_eps=1e-12,
)
BATCH = 2
SEQ = 8


# ----------------------- fused encoder Pallas kernel -------------------------
def fused_bert_encoder_kernel(
        emb_ref,      # (B*S, H)        f32   embeddings (pre-LayerNorm), batch-flattened
        mask_ref,     # (B, 1, S)       f32   additive attention mask
        embln_ref,    # (2, 1, H)       f32   [gamma, beta] of embedding LayerNorm
        wqkv_ref,     # (L, H, 3H)      bf16  fused QKV projection
        wo_ref,       # (L, H, H)       bf16  attention output projection
        w1_ref,       # (L, H, I)       bf16  FFN in
        w2_ref,       # (L, I, H)       bf16  FFN out
        vecs_ref,     # (L, 6, H)       f32   [bo, ln1_g, ln1_b, b2, ln2_g, ln2_b]
        bias_ref,     # (L, 1, 3H + I)  f32   [b_qkv | b1]
        out_ref,      # (B*S, H)        f32
        *, batch, seq, num_layers, num_heads, eps):
    """Single invocation: the whole encoder stack for the whole batch, resident in VMEM."""
    BS, H = emb_ref.shape
    B, S = batch, seq
    Dh = H // num_heads
    scale = 1.0 / (float(Dh) ** 0.5)

    def layer_norm(x, g, b):
        mu = jnp.mean(x, axis=-1, keepdims=True)
        xc = x - mu
        var = jnp.mean(xc * xc, axis=-1, keepdims=True)
        return xc * jax.lax.rsqrt(var + eps) * g + b

    # embedding LayerNorm (batch-flattened)
    x = layer_norm(emb_ref[...], embln_ref[0], embln_ref[1])          # (BS, H) f32

    for l in range(num_layers):                                       # static unroll (tiny model)
        vecs = vecs_ref[l]                                            # (6, H) f32
        brow = bias_ref[l]                                            # (1, 3H+I) f32
        b_qkv = brow[:, :3 * H]                                       # (1, 3H)
        b_ffn = brow[:, 3 * H:]                                       # (1, I)

        # ---- fused QKV projection for the WHOLE batch (one MXU push, M=BS) ----
        xb = x.astype(jnp.bfloat16)
        qkv = jnp.dot(xb, wqkv_ref[l], preferred_element_type=jnp.float32) + b_qkv   # (BS, 3H) f32
        qkvb = qkv.astype(jnp.bfloat16)

        # ---- self-attention: relayout to (heads, S, Dh) once, head-batched einsums ----
        ctx_rows = []
        for b in range(B):                                            # per-batch (S,S) matmuls only
            rows = qkvb[b * S:(b + 1) * S]                            # (S, 3H) sublane slice
            q = jnp.stack([rows[:, h * Dh:(h + 1) * Dh] for h in range(num_heads)])           # (nH,S,Dh)
            k = jnp.stack([rows[:, H + h * Dh:H + (h + 1) * Dh] for h in range(num_heads)])
            v = jnp.stack([rows[:, 2 * H + h * Dh:2 * H + (h + 1) * Dh] for h in range(num_heads)])

            # scores: contract on Dh (no explicit transpose), batched over heads
            s = jnp.einsum('hsd,hkd->hsk', q, k,
                           preferred_element_type=jnp.float32) * scale                         # (nH,S,S)
            s = s + mask_ref[b]                                       # (1,S) additive mask broadcast
            s = s - jnp.max(s, axis=-1, keepdims=True)
            p = jnp.exp(s)
            p = p * pl.reciprocal(jnp.sum(p, axis=-1, keepdims=True), approx=True)

            ctx = jnp.einsum('hsk,hkd->hsd', p.astype(jnp.bfloat16), v,
                             preferred_element_type=jnp.float32)                               # (nH,S,Dh)
            # merge heads back into contiguous lanes -> (S, H)
            ctx_rows.append(jnp.concatenate([ctx[h] for h in range(num_heads)], axis=-1))
        ctx_all = jnp.concatenate(ctx_rows, axis=0).astype(jnp.bfloat16)                       # (BS, H)

        # ---- single output projection for the whole batch ----
        attn = jnp.dot(ctx_all, wo_ref[l], preferred_element_type=jnp.float32) + vecs[0:1]
        x = layer_norm(attn + x, vecs[1:2], vecs[2:3])

        # ---- feed-forward (exact erf-GELU, as in HF BERT), batch-flattened ----
        inter = jnp.dot(x.astype(jnp.bfloat16), w1_ref[l],
                        preferred_element_type=jnp.float32) + b_ffn
        inter = 0.5 * inter * (1.0 + jax.lax.erf(inter * 0.7071067811865476))
        ffn = jnp.dot(inter.astype(jnp.bfloat16), w2_ref[l],
                      preferred_element_type=jnp.float32) + vecs[3:4]
        x = layer_norm(ffn + x, vecs[4:5], vecs[5:6])

    out_ref[...] = x.astype(out_ref.dtype)


def fused_encoder(emb_flat, ext_mask, params, cfg):
    BS, H = emb_flat.shape
    B = ext_mask.shape[0]
    S = BS // B

    kern = functools.partial(
        fused_bert_encoder_kernel,
        batch=B, seq=S,
        num_layers=cfg["layers"], num_heads=cfg["heads"], eps=cfg["ln_eps"])

    vmem = pl.BlockSpec(memory_space=pltpu.MemorySpace.VMEM)  # whole array resident in VMEM
    return pl.pallas_call(
        kern,
        out_shape=jax.ShapeDtypeStruct((BS, H), jnp.float32),
        in_specs=[vmem] * 9,
        out_specs=vmem,
    )(emb_flat, ext_mask, params["emb_ln"], params["w_qkv"], params["wo"],
      params["w1"], params["w2"], params["vecs_h"], params["b_qkv_ffn"])


# ----------------------------- parameters ------------------------------------
def init_params(key, cfg):
    H, I = cfg["hidden"], cfg["intermediate"]
    V, P, T, L = cfg["vocab"], cfg["max_pos"], cfg["type_vocab"], cfg["layers"]
    std = 0.02

    def n(k, shape):
        return jax.random.normal(k, shape, jnp.float32) * std

    keys = jax.random.split(key, 8)
    ones_h = jnp.ones((L, 1, H), jnp.float32)
    zeros_h = jnp.zeros((L, 1, H), jnp.float32)
    return {
        "word_emb": n(keys[0], (V, H)),
        "pos_emb": n(keys[1], (P, H)),
        "type_emb": n(keys[2], (T, H)),
        # embedding LayerNorm gamma/beta stacked: (2, 1, H)
        "emb_ln": jnp.concatenate(
            [jnp.ones((1, 1, H), jnp.float32), jnp.zeros((1, 1, H), jnp.float32)], axis=0),
        # big matmul weights stacked on a leading layer axis, stored bf16 (MXU-native)
        "w_qkv": n(keys[3], (L, H, 3 * H)).astype(jnp.bfloat16),
        "wo":    n(keys[4], (L, H, H)).astype(jnp.bfloat16),
        "w1":    n(keys[5], (L, H, I)).astype(jnp.bfloat16),
        "w2":    n(keys[6], (L, I, H)).astype(jnp.bfloat16),
        # packed per-layer (1,H) vectors: [bo, ln1_g, ln1_b, b2, ln2_g, ln2_b] -> (L, 6, H)
        "vecs_h": jnp.concatenate(
            [zeros_h, ones_h, zeros_h, zeros_h, ones_h, zeros_h], axis=1),
        # packed QKV bias (3H) and FFN intermediate bias (I) -> (L, 1, 3H+I)
        "b_qkv_ffn": jnp.zeros((L, 1, 3 * H + I), jnp.float32),
        "qa_w": n(keys[7], (H, 2)),
        "qa_b": jnp.zeros((2,), jnp.float32),
    }


# ----------------------------- forward ----------------------------------------
def bert_qa_forward(params, input_ids, attention_mask, token_type_ids,
                    start_positions, end_positions, cfg):
    B, S = input_ids.shape
    H = cfg["hidden"]

    # --- embeddings (gathers are glue; LayerNorm happens inside the fused kernel) ---
    emb = (params["word_emb"][input_ids]
           + params["pos_emb"][:S][None, :, :]
           + params["type_emb"][token_type_ids])                 # (B, S, H)

    # HF-style additive extended attention mask, (B, 1, S)
    ext_mask = (1.0 - attention_mask.astype(jnp.float32))[:, None, :] * (-1e9)

    # --- whole encoder stack (all layers, whole batch) in ONE grid-less Pallas call ---
    hidden = fused_encoder(emb.reshape(B * S, H), ext_mask, params, cfg).reshape(B, S, H)

    # --- QA head (output width 2 -> plain JAX, not worth a Pallas launch) ---
    logits = jnp.einsum("bsh,hn->bsn", hidden, params["qa_w"]) + params["qa_b"]
    start_logits = logits[..., 0]
    end_logits = logits[..., 1]

    # --- loss: CrossEntropy with ignore_index = S (positions clamped to [0, S]) ---
    ignored_index = S

    def cross_entropy(lg, pos):
        pos = jnp.clip(pos, 0, ignored_index).astype(jnp.int32)
        lse = jax.nn.logsumexp(lg, axis=-1)                      # (B,)
        idx = jnp.minimum(pos, S - 1)
        tgt = jnp.take_along_axis(lg, idx[:, None], axis=-1)[:, 0]
        valid = (pos != ignored_index).astype(jnp.float32)
        # Matches torch.nn.CrossEntropyLoss(ignore_index=S): mean over valid targets.
        return jnp.sum((lse - tgt) * valid) / jnp.sum(valid)

    start_loss = cross_entropy(start_logits, start_positions)
    end_loss = cross_entropy(end_logits, end_positions)
    loss = 0.5 * (start_loss + end_loss)

    # TODO(synk): dropout layers of the HF model are omitted (deterministic eval-style forward).
    return loss, start_logits, end_logits


# ----------------------------- main ------------------------------------------
if __name__ == "__main__":
    key = jax.random.PRNGKey(0)
    pkey, k_ids, k_type, k_sp, k_ep = jax.random.split(key, 5)

    params = init_params(pkey, CFG)

    input_ids = jax.random.randint(k_ids, (BATCH, SEQ), 0, CFG["vocab"], dtype=jnp.int32)
    token_type_ids = jax.random.randint(k_type, (BATCH, SEQ), 0, CFG["type_vocab"], dtype=jnp.int32)
    attention_mask = jnp.array(
        [[1] * SEQ, [1] * (SEQ - 2) + [0, 0]], dtype=jnp.int32)  # pad the tail of example 1
    start_positions = jax.random.randint(k_sp, (BATCH,), 0, SEQ, dtype=jnp.int32)
    end_positions = jax.random.randint(k_ep, (BATCH,), 0, SEQ, dtype=jnp.int32)

    fwd = jax.jit(functools.partial(bert_qa_forward, cfg=CFG))
    loss, start_logits, end_logits = fwd(params, input_ids, attention_mask,
                                         token_type_ids, start_positions, end_positions)
    jax.block_until_ready((loss, start_logits, end_logits))

    assert start_logits.shape == (BATCH, SEQ)
    assert end_logits.shape == (BATCH, SEQ)
    assert loss.shape == ()
    print("KERNEL_OK")
</pallas_src>

<mosaic_0001>
module attributes {stable_mosaic.version = 11 : i64} {
  func.func @fused_bert_encoder_kernel(%arg0: memref<16x32xf32, #tpu.memory_space<vmem>>, %arg1: memref<2x1x8xf32, #tpu.memory_space<vmem>>, %arg2: memref<2x1x32xf32, #tpu.memory_space<vmem>>, %arg3: memref<2x32x96xbf16, #tpu.memory_space<vmem>>, %arg4: memref<2x32x32xbf16, #tpu.memory_space<vmem>>, %arg5: memref<2x32x64xbf16, #tpu.memory_space<vmem>>, %arg6: memref<2x64x32xbf16, #tpu.memory_space<vmem>>, %arg7: memref<2x6x32xf32, #tpu.memory_space<vmem>>, %arg8: memref<2x1x160xf32, #tpu.memory_space<vmem>>, %arg9: memref<16x32xf32, #tpu.memory_space<vmem>>) attributes {dimension_semantics = [], scalar_prefetch = 0 : i64, scratch_operands = 0 : i64, tpu.core_type = #tpu.core_type<tc>} {
    %c0 = arith.constant 0 : index
    %c0_0 = arith.constant 0 : index
    %0 = vector.load %arg0[%c0, %c0_0] : memref<16x32xf32, #tpu.memory_space<vmem>>, vector<16x32xf32>
    %c0_1 = arith.constant 0 : index
    %c0_2 = arith.constant 0 : index
    %c0_3 = arith.constant 0 : index
    %1 = vector.load %arg2[%c0_1, %c0_2, %c0_3] : memref<2x1x32xf32, #tpu.memory_space<vmem>>, vector<1x1x32xf32>
    %2 = vector.shape_cast %1 : vector<1x1x32xf32> to vector<1x32xf32>
    %c1 = arith.constant 1 : index
    %c0_4 = arith.constant 0 : index
    %c0_5 = arith.constant 0 : index
    %3 = vector.load %arg2[%c1, %c0_4, %c0_5] : memref<2x1x32xf32, #tpu.memory_space<vmem>>, vector<1x1x32xf32>
    %4 = vector.shape_cast %3 : vector<1x1x32xf32> to vector<1x32xf32>
    %cst = arith.constant dense<0.000000e+00> : vector<16xf32>
    %5 = vector.multi_reduction <add>, %0, %cst [1] : vector<16x32xf32> to vector<16xf32>
    %6 = vector.shape_cast %5 : vector<16xf32> to vector<16x1xf32>
    %cst_6 = arith.constant 3.200000e+01 : f32
    %7 = vector.broadcast %cst_6 : f32 to vector<16x1xf32>
    %8 = arith.divf %6, %7 : vector<16x1xf32>
    %9 = vector.broadcast %8 : vector<16x1xf32> to vector<16x32xf32>
    %10 = arith.subf %0, %9 : vector<16x32xf32>
    %11 = arith.mulf %10, %10 : vector<16x32xf32>
    %cst_7 = arith.constant dense<0.000000e+00> : vector<16xf32>
    %12 = vector.multi_reduction <add>, %11, %cst_7 [1] : vector<16x32xf32> to vector<16xf32>
    %13 = vector.shape_cast %12 : vector<16xf32> to vector<16x1xf32>
    %cst_8 = arith.constant 3.200000e+01 : f32
    %14 = vector.broadcast %cst_8 : f32 to vector<16x1xf32>
    %15 = arith.divf %13, %14 : vector<16x1xf32>
    %cst_9 = arith.constant 9.99999996E-13 : f32
    %16 = vector.broadcast %cst_9 : f32 to vector<16x1xf32>
    %17 = arith.addf %15, %16 : vector<16x1xf32>
    %18 = math.rsqrt %17 : vector<16x1xf32>
    %19 = vector.broadcast %18 : vector<16x1xf32> to vector<16x32xf32>
    %20 = arith.mulf %10, %19 : vector<16x32xf32>
    %21 = vector.broadcast %2 : vector<1x32xf32> to vector<16x32xf32>
    %22 = arith.mulf %20, %21 : vector<16x32xf32>
    %23 = vector.broadcast %4 : vector<1x32xf32> to vector<16x32xf32>
    %24 = arith.addf %22, %23 : vector<16x32xf32>
    %c0_10 = arith.constant 0 : index
    %c0_11 = arith.constant 0 : index
    %c0_12 = arith.constant 0 : index
    %25 = vector.load %arg7[%c0_10, %c0_11, %c0_12] : memref<2x6x32xf32, #tpu.memory_space<vmem>>, vector<1x6x32xf32>
    %26 = vector.shape_cast %25 : vector<1x6x32xf32> to vector<6x32xf32>
    %c0_13 = arith.constant 0 : index
    %c0_14 = arith.constant 0 : index
    %c0_15 = arith.constant 0 : index
    %27 = vector.load %arg8[%c0_13, %c0_14, %c0_15] : memref<2x1x160xf32, #tpu.memory_space<vmem>>, vector<1x1x160xf32>
    %28 = vector.shape_cast %27 : vector<1x1x160xf32> to vector<1x160xf32>
    %29 = vector.extract_strided_slice %28 {offsets = [0, 0], sizes = [1, 96], strides = [1, 1]} : vector<1x160xf32> to vector<1x96xf32>
    %30 = vector.extract_strided_slice %28 {offsets = [0, 96], sizes = [1, 64], strides = [1, 1]} : vector<1x160xf32> to vector<1x64xf32>
    %31 = arith.truncf %24 : vector<16x32xf32> to vector<16x32xbf16>
    %c0_16 = arith.constant 0 : index
    %c0_17 = arith.constant 0 : index
    %c0_18 = arith.constant 0 : index
    %32 = vector.load %arg3[%c0_16, %c0_17, %c0_18] : memref<2x32x96xbf16, #tpu.memory_space<vmem>>, vector<1x32x96xbf16>
    %33 = vector.shape_cast %32 : vector<1x32x96xbf16> to vector<32x96xbf16>
    %cst_19 = arith.constant dense<0.000000e+00> : vector<16x96xf32>
    %34 = tpu.matmul %31, %33, %cst_19 {dimension_numbers = #tpu.dot_dimension_numbers<[1], [0], [0], [1], [0, 0, 1, 1], [], []>} : vector<16x32xbf16>, vector<32x96xbf16>, vector<16x96xf32> -> vector<16x96xf32>
    %35 = vector.broadcast %29 : vector<1x96xf32> to vector<16x96xf32>
    %36 = arith.addf %34, %35 : vector<16x96xf32>
    %37 = arith.truncf %36 : vector<16x96xf32> to vector<16x96xbf16>
    %38 = vector.extract_strided_slice %37 {offsets = [0, 0], sizes = [8, 96], strides = [1, 1]} : vector<16x96xbf16> to vector<8x96xbf16>
    %39 = vector.extract_strided_slice %38 {offsets = [0, 0], sizes = [8, 8], strides = [1, 1]} : vector<8x96xbf16> to vector<8x8xbf16>
    %40 = vector.extract_strided_slice %38 {offsets = [0, 8], sizes = [8, 8], strides = [1, 1]} : vector<8x96xbf16> to vector<8x8xbf16>
    %41 = vector.extract_strided_slice %38 {offsets = [0, 16], sizes = [8, 8], strides = [1, 1]} : vector<8x96xbf16> to vector<8x8xbf16>
    %42 = vector.extract_strided_slice %38 {offsets = [0, 24], sizes = [8, 8], strides = [1, 1]} : vector<8x96xbf16> to vector<8x8xbf16>
    %43 = vector.shape_cast %39 : vector<8x8xbf16> to vector<1x8x8xbf16>
    %44 = vector.shape_cast %40 : vector<8x8xbf16> to vector<1x8x8xbf16>
    %45 = vector.shape_cast %41 : vector<8x8xbf16> to vector<1x8x8xbf16>
    %46 = vector.shape_cast %42 : vector<8x8xbf16> to vector<1x8x8xbf16>
    %47 = tpu.concatenate %43, %44, %45, %46 in 0 : vector<1x8x8xbf16>, vector<1x8x8xbf16>, vector<1x8x8xbf16>, vector<1x8x8xbf16> -> vector<4x8x8xbf16>
    %48 = vector.extract_strided_slice %38 {offsets = [0, 32], sizes = [8, 8], strides = [1, 1]} : vector<8x96xbf16> to vector<8x8xbf16>
    %49 = vector.extract_strided_slice %38 {offsets = [0, 40], sizes = [8, 8], strides = [1, 1]} : vector<8x96xbf16> to vector<8x8xbf16>
    %50 = vector.extract_strided_slice %38 {offsets = [0, 48], sizes = [8, 8], strides = [1, 1]} : vector<8x96xbf16> to vector<8x8xbf16>
    %51 = vector.extract_strided_slice %38 {offsets = [0, 56], sizes = [8, 8], strides = [1, 1]} : vector<8x96xbf16> to vector<8x8xbf16>
    %52 = vector.shape_cast %48 : vector<8x8xbf16> to vector<1x8x8xbf16>
    %53 = vector.shape_cast %49 : vector<8x8xbf16> to vector<1x8x8xbf16>
    %54 = vector.shape_cast %50 : vector<8x8xbf16> to vector<1x8x8xbf16>
    %55 = vector.shape_cast %51 : vector<8x8xbf16> to vector<1x8x8xbf16>
    %56 = tpu.concatenate %52, %53, %54, %55 in 0 : vector<1x8x8xbf16>, vector<1x8x8xbf16>, vector<1x8x8xbf16>, vector<1x8x8xbf16> -> vector<4x8x8xbf16>
    %57 = vector.extract_strided_slice %38 {offsets = [0, 64], sizes = [8, 8], strides = [1, 1]} : vector<8x96xbf16> to vector<8x8xbf16>
    %58 = vector.extract_strided_slice %38 {offsets = [0, 72], sizes = [8, 8], strides = [1, 1]} : vector<8x96xbf16> to vector<8x8xbf16>
    %59 = vector.extract_strided_slice %38 {offsets = [0, 80], sizes = [8, 8], strides = [1, 1]} : vector<8x96xbf16> to vector<8x8xbf16>
    %60 = vector.extract_strided_slice %38 {offsets = [0, 88], sizes = [8, 8], strides = [1, 1]} : vector<8x96xbf16> to vector<8x8xbf16>
    %61 = vector.shape_cast %57 : vector<8x8xbf16> to vector<1x8x8xbf16>
    %62 = vector.shape_cast %58 : vector<8x8xbf16> to vector<1x8x8xbf16>
    %63 = vector.shape_cast %59 : vector<8x8xbf16> to vector<1x8x8xbf16>
    %64 = vector.shape_cast %60 : vector<8x8xbf16> to vector<1x8x8xbf16>
    %65 = tpu.concatenate %61, %62, %63, %64 in 0 : vector<1x8x8xbf16>, vector<1x8x8xbf16>, vector<1x8x8xbf16>, vector<1x8x8xbf16> -> vector<4x8x8xbf16>
    "tpu.trace_start"() <{level = 10 : i32, message = "hsd,hkd->hsk"}> : () -> ()
    %cst_20 = arith.constant dense<0.000000e+00> : vector<4x8x8xf32>
    %66 = tpu.matmul %47, %56, %cst_20 {dimension_numbers = #tpu.dot_dimension_numbers<[2], [2], [1], [1], [0, 0, 0, 1, 1, 1], [0], [0]>} : vector<4x8x8xbf16>, vector<4x8x8xbf16>, vector<4x8x8xf32> -> vector<4x8x8xf32>
    "tpu.trace_stop"() : () -> ()
    %cst_21 = arith.constant 0.353553385 : f32
    %67 = vector.broadcast %cst_21 : f32 to vector<4x8x8xf32>
    %68 = arith.mulf %66, %67 : vector<4x8x8xf32>
    %c0_22 = arith.constant 0 : index
    %c0_23 = arith.constant 0 : index
    %c0_24 = arith.constant 0 : index
    %69 = vector.load %arg1[%c0_22, %c0_23, %c0_24] : memref<2x1x8xf32, #tpu.memory_space<vmem>>, vector<1x1x8xf32>
    %70 = vector.shape_cast %69 : vector<1x1x8xf32> to vector<1x8xf32>
    %71 = vector.shape_cast %70 : vector<1x8xf32> to vector<1x1x8xf32>
    %72 = vector.broadcast %71 : vector<1x1x8xf32> to vector<4x8x8xf32>
    %73 = arith.addf %68, %72 : vector<4x8x8xf32>
    %cst_25 = arith.constant dense<0xFF800000> : vector<4x8xf32>
    %74 = vector.multi_reduction <maximumf>, %73, %cst_25 [2] : vector<4x8x8xf32> to vector<4x8xf32>
    %75 = vector.shape_cast %74 : vector<4x8xf32> to vector<4x8x1xf32>
    %76 = vector.broadcast %75 : vector<4x8x1xf32> to vector<4x8x8xf32>
    %77 = arith.subf %73, %76 : vector<4x8x8xf32>
    %78 = math.exp %77 : vector<4x8x8xf32>
    %cst_26 = arith.constant dense<0.000000e+00> : vector<4x8xf32>
    %79 = vector.multi_reduction <add>, %78, %cst_26 [2] : vector<4x8x8xf32> to vector<4x8xf32>
    %80 = vector.shape_cast %79 : vector<4x8xf32> to vector<4x8x1xf32>
    %81 = tpu.reciprocal %80 {approx = true} : vector<4x8x1xf32> -> vector<4x8x1xf32>
    %82 = vector.broadcast %81 : vector<4x8x1xf32> to vector<4x8x8xf32>
    %83 = arith.mulf %78, %82 : vector<4x8x8xf32>
    %84 = arith.truncf %83 : vector<4x8x8xf32> to vector<4x8x8xbf16>
    "tpu.trace_start"() <{level = 10 : i32, message = "hsk,hkd->hsd"}> : () -> ()
    %cst_27 = arith.constant dense<0.000000e+00> : vector<4x8x8xf32>
    %85 = tpu.matmul %84, %65, %cst_27 {dimension_numbers = #tpu.dot_dimension_numbers<[2], [1], [1], [2], [0, 0, 0, 1, 1, 2], [0], [0]>} : vector<4x8x8xbf16>, vector<4x8x8xbf16>, vector<4x8x8xf32> -> vector<4x8x8xf32>
    "tpu.trace_stop"() : () -> ()
    %86 = vector.extract_strided_slice %85 {offsets = [0, 0, 0], sizes = [1, 8, 8], strides = [1, 1, 1]} : vector<4x8x8xf32> to vector<1x8x8xf32>
    %87 = vector.shape_cast %86 : vector<1x8x8xf32> to vector<8x8xf32>
    %88 = vector.extract_strided_slice %85 {offsets = [1, 0, 0], sizes = [1, 8, 8], strides = [1, 1, 1]} : vector<4x8x8xf32> to vector<1x8x8xf32>
    %89 = vector.shape_cast %88 : vector<1x8x8xf32> to vector<8x8xf32>
    %90 = vector.extract_strided_slice %85 {offsets = [2, 0, 0], sizes = [1, 8, 8], strides = [1, 1, 1]} : vector<4x8x8xf32> to vector<1x8x8xf32>
    %91 = vector.shape_cast %90 : vector<1x8x8xf32> to vector<8x8xf32>
    %92 = vector.extract_strided_slice %85 {offsets = [3, 0, 0], sizes = [1, 8, 8], strides = [1, 1, 1]} : vector<4x8x8xf32> to vector<1x8x8xf32>
    %93 = vector.shape_cast %92 : vector<1x8x8xf32> to vector<8x8xf32>
    %94 = tpu.concatenate %87, %89, %91, %93 in 1 : vector<8x8xf32>, vector<8x8xf32>, vector<8x8xf32>, vector<8x8xf32> -> vector<8x32xf32>
    %95 = vector.extract_strided_slice %37 {offsets = [8, 0], sizes = [8, 96], strides = [1, 1]} : vector<16x96xbf16> to vector<8x96xbf16>
    %96 = vector.extract_strided_slice %95 {offsets = [0, 0], sizes = [8, 8], strides = [1, 1]} : vector<8x96xbf16> to vector<8x8xbf16>
    %97 = vector.extract_strided_slice %95 {offsets = [0, 8], sizes = [8, 8], strides = [1, 1]} : vector<8x96xbf16> to vector<8x8xbf16>
    %98 = vector.extract_strided_slice %95 {offsets = [0, 16], sizes = [8, 8], strides = [1, 1]} : vector<8x96xbf16> to vector<8x8xbf16>
    %99 = vector.extract_strided_slice %95 {offsets = [0, 24], sizes = [8, 8], strides = [1, 1]} : vector<8x96xbf16> to vector<8x8xbf16>
    %100 = vector.shape_cast %96 : vector<8x8xbf16> to vector<1x8x8xbf16>
    %101 = vector.shape_cast %97 : vector<8x8xbf16> to vector<1x8x8xbf16>
    %102 = vector.shape_cast %98 : vector<8x8xbf16> to vector<1x8x8xbf16>
    %103 = vector.shape_cast %99 : vector<8x8xbf16> to vector<1x8x8xbf16>
    %104 = tpu.concatenate %100, %101, %102, %103 in 0 : vector<1x8x8xbf16>, vector<1x8x8xbf16>, vector<1x8x8xbf16>, vector<1x8x8xbf16> -> vector<4x8x8xbf16>
    %105 = vector.extract_strided_slice %95 {offsets = [0, 32], sizes = [8, 8], strides = [1, 1]} : vector<8x96xbf16> to vector<8x8xbf16>
    %106 = vector.extract_strided_slice %95 {offsets = [0, 40], sizes = [8, 8], strides = [1, 1]} : vector<8x96xbf16> to vector<8x8xbf16>
    %107 = vector.extract_strided_slice %95 {offsets = [0, 48], sizes = [8, 8], strides = [1, 1]} : vector<8x96xbf16> to vector<8x8xbf16>
    %108 = vector.extract_strided_slice %95 {offsets = [0, 56], sizes = [8, 8], strides = [1, 1]} : vector<8x96xbf16> to vector<8x8xbf16>
    %109 = vector.shape_cast %105 : vector<8x8xbf16> to vector<1x8x8xbf16>
    %110 = vector.shape_cast %106 : vector<8x8xbf16> to vector<1x8x8xbf16>
    %111 = vector.shape_cast %107 : vector<8x8xbf16> to vector<1x8x8xbf16>
    %112 = vector.shape_cast %108 : vector<8x8xbf16> to vector<1x8x8xbf16>
    %113 = tpu.concatenate %109, %110, %111, %112 in 0 : vector<1x8x8xbf16>, vector<1x8x8xbf16>, vector<1x8x8xbf16>, vector<1x8x8xbf16> -> vector<4x8x8xbf16>
    %114 = vector.extract_strided_slice %95 {offsets = [0, 64], sizes = [8, 8], strides = [1, 1]} : vector<8x96xbf16> to vector<8x8xbf16>
    %115 = vector.extract_strided_slice %95 {offsets = [0, 72], sizes = [8, 8], strides = [1, 1]} : vector<8x96xbf16> to vector<8x8xbf16>
    %116 = vector.extract_strided_slice %95 {offsets = [0, 80], sizes = [8, 8], strides = [1, 1]} : vector<8x96xbf16> to vector<8x8xbf16>
    %117 = vector.extract_strided_slice %95 {offsets = [0, 88], sizes = [8, 8], strides = [1, 1]} : vector<8x96xbf16> to vector<8x8xbf16>
    %118 = vector.shape_cast %114 : vector<8x8xbf16> to vector<1x8x8xbf16>
    %119 = vector.shape_cast %115 : vector<8x8xbf16> to vector<1x8x8xbf16>
    %120 = vector.shape_cast %116 : vector<8x8xbf16> to vector<1x8x8xbf16>
    %121 = vector.shape_cast %117 : vector<8x8xbf16> to vector<1x8x8xbf16>
    %122 = tpu.concatenate %118, %119, %120, %121 in 0 : vector<1x8x8xbf16>, vector<1x8x8xbf16>, vector<1x8x8xbf16>, vector<1x8x8xbf16> -> vector<4x8x8xbf16>
    "tpu.trace_start"() <{level = 10 : i32, message = "hsd,hkd->hsk"}> : () -> ()
    %cst_28 = arith.constant dense<0.000000e+00> : vector<4x8x8xf32>
    %123 = tpu.matmul %104, %113, %cst_28 {dimension_numbers = #tpu.dot_dimension_numbers<[2], [2], [1], [1], [0, 0, 0, 1, 1, 1], [0], [0]>} : vector<4x8x8xbf16>, vector<4x8x8xbf16>, vector<4x8x8xf32> -> vector<4x8x8xf32>
    "tpu.trace_stop"() : () -> ()
    %cst_29 = arith.constant 0.353553385 : f32
    %124 = vector.broadcast %cst_29 : f32 to vector<4x8x8xf32>
    %125 = arith.mulf %123, %124 : vector<4x8x8xf32>
    %c1_30 = arith.constant 1 : index
    %c0_31 = arith.constant 0 : index
    %c0_32 = arith.constant 0 : index
    %126 = vector.load %arg1[%c1_30, %c0_31, %c0_32] : memref<2x1x8xf32, #tpu.memory_space<vmem>>, vector<1x1x8xf32>
    %127 = vector.shape_cast %126 : vector<1x1x8xf32> to vector<1x8xf32>
    %128 = vector.shape_cast %127 : vector<1x8xf32> to vector<1x1x8xf32>
    %129 = vector.broadcast %128 : vector<1x1x8xf32> to vector<4x8x8xf32>
    %130 = arith.addf %125, %129 : vector<4x8x8xf32>
    %cst_33 = arith.constant dense<0xFF800000> : vector<4x8xf32>
    %131 = vector.multi_reduction <maximumf>, %130, %cst_33 [2] : vector<4x8x8xf32> to vector<4x8xf32>
    %132 = vector.shape_cast %131 : vector<4x8xf32> to vector<4x8x1xf32>
    %133 = vector.broadcast %132 : vector<4x8x1xf32> to vector<4x8x8xf32>
    %134 = arith.subf %130, %133 : vector<4x8x8xf32>
    %135 = math.exp %134 : vector<4x8x8xf32>
    %cst_34 = arith.constant dense<0.000000e+00> : vector<4x8xf32>
    %136 = vector.multi_reduction <add>, %135, %cst_34 [2] : vector<4x8x8xf32> to vector<4x8xf32>
    %137 = vector.shape_cast %136 : vector<4x8xf32> to vector<4x8x1xf32>
    %138 = tpu.reciprocal %137 {approx = true} : vector<4x8x1xf32> -> vector<4x8x1xf32>
    %139 = vector.broadcast %138 : vector<4x8x1xf32> to vector<4x8x8xf32>
    %140 = arith.mulf %135, %139 : vector<4x8x8xf32>
    %141 = arith.truncf %140 : vector<4x8x8xf32> to vector<4x8x8xbf16>
    "tpu.trace_start"() <{level = 10 : i32, message = "hsk,hkd->hsd"}> : () -> ()
    %cst_35 = arith.constant dense<0.000000e+00> : vector<4x8x8xf32>
    %142 = tpu.matmul %141, %122, %cst_35 {dimension_numbers = #tpu.dot_dimension_numbers<[2], [1], [1], [2], [0, 0, 0, 1, 1, 2], [0], [0]>} : vector<4x8x8xbf16>, vector<4x8x8xbf16>, vector<4x8x8xf32> -> vector<4x8x8xf32>
    "tpu.trace_stop"() : () -> ()
    %143 = vector.extract_strided_slice %142 {offsets = [0, 0, 0], sizes = [1, 8, 8], strides = [1, 1, 1]} : vector<4x8x8xf32> to vector<1x8x8xf32>
    %144 = vector.shape_cast %143 : vector<1x8x8xf32> to vector<8x8xf32>
    %145 = vector.extract_strided_slice %142 {offsets = [1, 0, 0], sizes = [1, 8, 8], strides = [1, 1, 1]} : vector<4x8x8xf32> to vector<1x8x8xf32>
    %146 = vector.shape_cast %145 : vector<1x8x8xf32> to vector<8x8xf32>
    %147 = vector.extract_strided_slice %142 {offsets = [2, 0, 0], sizes = [1, 8, 8], strides = [1, 1, 1]} : vector<4x8x8xf32> to vector<1x8x8xf32>
    %148 = vector.shape_cast %147 : vector<1x8x8xf32> to vector<8x8xf32>
    %149 = vector.extract_strided_slice %142 {offsets = [3, 0, 0], sizes = [1, 8, 8], strides = [1, 1, 1]} : vector<4x8x8xf32> to vector<1x8x8xf32>
    %150 = vector.shape_cast %149 : vector<1x8x8xf32> to vector<8x8xf32>
    %151 = tpu.concatenate %144, %146, %148, %150 in 1 : vector<8x8xf32>, vector<8x8xf32>, vector<8x8xf32>, vector<8x8xf32> -> vector<8x32xf32>
    %152 = tpu.concatenate %94, %151 in 0 : vector<8x32xf32>, vector<8x32xf32> -> vector<16x32xf32>
    %153 = arith.truncf %152 : vector<16x32xf32> to vector<16x32xbf16>
    %c0_36 = arith.constant 0 : index
    %c0_37 = arith.constant 0 : index
    %c0_38 = arith.constant 0 : index
    %154 = vector.load %arg4[%c0_36, %c0_37, %c0_38] : memref<2x32x32xbf16, #tpu.memory_space<vmem>>, vector<1x32x32xbf16>
    %155 = vector.shape_cast %154 : vector<1x32x32xbf16> to vector<32x32xbf16>
    %cst_39 = arith.constant dense<0.000000e+00> : vector<16x32xf32>
    %156 = tpu.matmul %153, %155, %cst_39 {dimension_numbers = #tpu.dot_dimension_numbers<[1], [0], [0], [1], [0, 0, 1, 1], [], []>} : vector<16x32xbf16>, vector<32x32xbf16>, vector<16x32xf32> -> vector<16x32xf32>
    %157 = vector.extract_strided_slice %26 {offsets = [0, 0], sizes = [1, 32], strides = [1, 1]} : vector<6x32xf32> to vector<1x32xf32>
    %158 = vector.broadcast %157 : vector<1x32xf32> to vector<16x32xf32>
    %159 = arith.addf %156, %158 : vector<16x32xf32>
    %160 = arith.addf %159, %24 : vector<16x32xf32>
    %161 = vector.extract_strided_slice %26 {offsets = [1, 0], sizes = [1, 32], strides = [1, 1]} : vector<6x32xf32> to vector<1x32xf32>
    %162 = vector.extract_strided_slice %26 {offsets = [2, 0], sizes = [1, 32], strides = [1, 1]} : vector<6x32xf32> to vector<1x32xf32>
    %cst_40 = arith.constant dense<0.000000e+00> : vector<16xf32>
    %163 = vector.multi_reduction <add>, %160, %cst_40 [1] : vector<16x32xf32> to vector<16xf32>
    %164 = vector.shape_cast %163 : vector<16xf32> to vector<16x1xf32>
    %cst_41 = arith.constant 3.200000e+01 : f32
    %165 = vector.broadcast %cst_41 : f32 to vector<16x1xf32>
    %166 = arith.divf %164, %165 : vector<16x1xf32>
    %167 = vector.broadcast %166 : vector<16x1xf32> to vector<16x32xf32>
    %168 = arith.subf %160, %167 : vector<16x32xf32>
    %169 = arith.mulf %168, %168 : vector<16x32xf32>
    %cst_42 = arith.constant dense<0.000000e+00> : vector<16xf32>
    %170 = vector.multi_reduction <add>, %169, %cst_42 [1] : vector<16x32xf32> to vector<16xf32>
    %171 = vector.shape_cast %170 : vector<16xf32> to vector<16x1xf32>
    %cst_43 = arith.constant 3.200000e+01 : f32
    %172 = vector.broadcast %cst_43 : f32 to vector<16x1xf32>
    %173 = arith.divf %171, %172 : vector<16x1xf32>
    %cst_44 = arith.constant 9.99999996E-13 : f32
    %174 = vector.broadcast %cst_44 : f32 to vector<16x1xf32>
    %175 = arith.addf %173, %174 : vector<16x1xf32>
    %176 = math.rsqrt %175 : vector<16x1xf32>
    %177 = vector.broadcast %176 : vector<16x1xf32> to vector<16x32xf32>
    %178 = arith.mulf %168, %177 : vector<16x32xf32>
    %179 = vector.broadcast %161 : vector<1x32xf32> to vector<16x32xf32>
    %180 = arith.mulf %178, %179 : vector<16x32xf32>
    %181 = vector.broadcast %162 : vector<1x32xf32> to vector<16x32xf32>
    %182 = arith.addf %180, %181 : vector<16x32xf32>
    %183 = arith.truncf %182 : vector<16x32xf32> to vector<16x32xbf16>
    %c0_45 = arith.constant 0 : index
    %c0_46 = arith.constant 0 : index
    %c0_47 = arith.constant 0 : index
    %184 = vector.load %arg5[%c0_45, %c0_46, %c0_47] : memref<2x32x64xbf16, #tpu.memory_space<vmem>>, vector<1x32x64xbf16>
    %185 = vector.shape_cast %184 : vector<1x32x64xbf16> to vector<32x64xbf16>
    %cst_48 = arith.constant dense<0.000000e+00> : vector<16x64xf32>
    %186 = tpu.matmul %183, %185, %cst_48 {dimension_numbers = #tpu.dot_dimension_numbers<[1], [0], [0], [1], [0, 0, 1, 1], [], []>} : vector<16x32xbf16>, vector<32x64xbf16>, vector<16x64xf32> -> vector<16x64xf32>
    %187 = vector.broadcast %30 : vector<1x64xf32> to vector<16x64xf32>
    %188 = arith.addf %186, %187 : vector<16x64xf32>
    %cst_49 = arith.constant 5.000000e-01 : f32
    %189 = vector.broadcast %cst_49 : f32 to vector<16x64xf32>
    %190 = arith.mulf %189, %188 : vector<16x64xf32>
    %cst_50 = arith.constant 0.707106769 : f32
    %191 = vector.broadcast %cst_50 : f32 to vector<16x64xf32>
    %192 = arith.mulf %188, %191 : vector<16x64xf32>
    %193 = math.erf %192 : vector<16x64xf32>
    %cst_51 = arith.constant 1.000000e+00 : f32
    %194 = vector.broadcast %cst_51 : f32 to vector<16x64xf32>
    %195 = arith.addf %194, %193 : vector<16x64xf32>
    %196 = arith.mulf %190, %195 : vector<16x64xf32>
    %197 = arith.truncf %196 : vector<16x64xf32> to vector<16x64xbf16>
    %c0_52 = arith.constant 0 : index
    %c0_53 = arith.constant 0 : index
    %c0_54 = arith.constant 0 : index
    %198 = vector.load %arg6[%c0_52, %c0_53, %c0_54] : memref<2x64x32xbf16, #tpu.memory_space<vmem>>, vector<1x64x32xbf16>
    %199 = vector.shape_cast %198 : vector<1x64x32xbf16> to vector<64x32xbf16>
    %cst_55 = arith.constant dense<0.000000e+00> : vector<16x32xf32>
    %200 = tpu.matmul %197, %199, %cst_55 {dimension_numbers = #tpu.dot_dimension_numbers<[1], [0], [0], [1], [0, 0, 1, 1], [], []>} : vector<16x64xbf16>, vector<64x32xbf16>, vector<16x32xf32> -> vector<16x32xf32>
    %201 = vector.extract_strided_slice %26 {offsets = [3, 0], sizes = [1, 32], strides = [1, 1]} : vector<6x32xf32> to vector<1x32xf32>
    %202 = vector.broadcast %201 : vector<1x32xf32> to vector<16x32xf32>
    %203 = arith.addf %200, %202 : vector<16x32xf32>
    %204 = arith.addf %203, %182 : vector<16x32xf32>
    %205 = vector.extract_strided_slice %26 {offsets = [4, 0], sizes = [1, 32], strides = [1, 1]} : vector<6x32xf32> to vector<1x32xf32>
    %206 = vector.extract_strided_slice %26 {offsets = [5, 0], sizes = [1, 32], strides = [1, 1]} : vector<6x32xf32> to vector<1x32xf32>
    %cst_56 = arith.constant dense<0.000000e+00> : vector<16xf32>
    %207 = vector.multi_reduction <add>, %204, %cst_56 [1] : vector<16x32xf32> to vector<16xf32>
    %208 = vector.shape_cast %207 : vector<16xf32> to vector<16x1xf32>
    %cst_57 = arith.constant 3.200000e+01 : f32
    %209 = vector.broadcast %cst_57 : f32 to vector<16x1xf32>
    %210 = arith.divf %208, %209 : vector<16x1xf32>
    %211 = vector.broadcast %210 : vector<16x1xf32> to vector<16x32xf32>
    %212 = arith.subf %204, %211 : vector<16x32xf32>
    %213 = arith.mulf %212, %212 : vector<16x32xf32>
    %cst_58 = arith.constant dense<0.000000e+00> : vector<16xf32>
    %214 = vector.multi_reduction <add>, %213, %cst_58 [1] : vector<16x32xf32> to vector<16xf32>
    %215 = vector.shape_cast %214 : vector<16xf32> to vector<16x1xf32>
    %cst_59 = arith.constant 3.200000e+01 : f32
    %216 = vector.broadcast %cst_59 : f32 to vector<16x1xf32>
    %217 = arith.divf %215, %216 : vector<16x1xf32>
    %cst_60 = arith.constant 9.99999996E-13 : f32
    %218 = vector.broadcast %cst_60 : f32 to vector<16x1xf32>
    %219 = arith.addf %217, %218 : vector<16x1xf32>
    %220 = math.rsqrt %219 : vector<16x1xf32>
    %221 = vector.broadcast %220 : vector<16x1xf32> to vector<16x32xf32>
    %222 = arith.mulf %212, %221 : vector<16x32xf32>
    %223 = vector.broadcast %205 : vector<1x32xf32> to vector<16x32xf32>
    %224 = arith.mulf %222, %223 : vector<16x32xf32>
    %225 = vector.broadcast %206 : vector<1x32xf32> to vector<16x32xf32>
    %226 = arith.addf %224, %225 : vector<16x32xf32>
    %c1_61 = arith.constant 1 : index
    %c0_62 = arith.constant 0 : index
    %c0_63 = arith.constant 0 : index
    %227 = vector.load %arg7[%c1_61, %c0_62, %c0_63] : memref<2x6x32xf32, #tpu.memory_space<vmem>>, vector<1x6x32xf32>
    %228 = vector.shape_cast %227 : vector<1x6x32xf32> to vector<6x32xf32>
    %c1_64 = arith.constant 1 : index
    %c0_65 = arith.constant 0 : index
    %c0_66 = arith.constant 0 : index
    %229 = vector.load %arg8[%c1_64, %c0_65, %c0_66] : memref<2x1x160xf32, #tpu.memory_space<vmem>>, vector<1x1x160xf32>
    %230 = vector.shape_cast %229 : vector<1x1x160xf32> to vector<1x160xf32>
    %231 = vector.extract_strided_slice %230 {offsets = [0, 0], sizes = [1, 96], strides = [1, 1]} : vector<1x160xf32> to vector<1x96xf32>
    %232 = vector.extract_strided_slice %230 {offsets = [0, 96], sizes = [1, 64], strides = [1, 1]} : vector<1x160xf32> to vector<1x64xf32>
    %233 = arith.truncf %226 : vector<16x32xf32> to vector<16x32xbf16>
    %c1_67 = arith.constant 1 : index
    %c0_68 = arith.constant 0 : index
    %c0_69 = arith.constant 0 : index
    %234 = vector.load %arg3[%c1_67, %c0_68, %c0_69] : memref<2x32x96xbf16, #tpu.memory_space<vmem>>, vector<1x32x96xbf16>
    %235 = vector.shape_cast %234 : vector<1x32x96xbf16> to vector<32x96xbf16>
    %cst_70 = arith.constant dense<0.000000e+00> : vector<16x96xf32>
    %236 = tpu.matmul %233, %235, %cst_70 {dimension_numbers = #tpu.dot_dimension_numbers<[1], [0], [0], [1], [0, 0, 1, 1], [], []>} : vector<16x32xbf16>, vector<32x96xbf16>, vector<16x96xf32> -> vector<16x96xf32>
    %237 = vector.broadcast %231 : vector<1x96xf32> to vector<16x96xf32>
    %238 = arith.addf %236, %237 : vector<16x96xf32>
    %239 = arith.truncf %238 : vector<16x96xf32> to vector<16x96xbf16>
    %240 = vector.extract_strided_slice %239 {offsets = [0, 0], sizes = [8, 96], strides = [1, 1]} : vector<16x96xbf16> to vector<8x96xbf16>
    %241 = vector.extract_strided_slice %240 {offsets = [0, 0], sizes = [8, 8], strides = [1, 1]} : vector<8x96xbf16> to vector<8x8xbf16>
    %242 = vector.extract_strided_slice %240 {offsets = [0, 8], sizes = [8, 8], strides = [1, 1]} : vector<8x96xbf16> to vector<8x8xbf16>
    %243 = vector.extract_strided_slice %240 {offsets = [0, 16], sizes = [8, 8], strides = [1, 1]} : vector<8x96xbf16> to vector<8x8xbf16>
    %244 = vector.extract_strided_slice %240 {offsets = [0, 24], sizes = [8, 8], strides = [1, 1]} : vector<8x96xbf16> to vector<8x8xbf16>
    %245 = vector.shape_cast %241 : vector<8x8xbf16> to vector<1x8x8xbf16>
    %246 = vector.shape_cast %242 : vector<8x8xbf16> to vector<1x8x8xbf16>
    %247 = vector.shape_cast %243 : vector<8x8xbf16> to vector<1x8x8xbf16>
    %248 = vector.shape_cast %244 : vector<8x8xbf16> to vector<1x8x8xbf16>
    %249 = tpu.concatenate %245, %246, %247, %248 in 0 : vector<1x8x8xbf16>, vector<1x8x8xbf16>, vector<1x8x8xbf16>, vector<1x8x8xbf16> -> vector<4x8x8xbf16>
    %250 = vector.extract_strided_slice %240 {offsets = [0, 32], sizes = [8, 8], strides = [1, 1]} : vector<8x96xbf16> to vector<8x8xbf16>
    %251 = vector.extract_strided_slice %240 {offsets = [0, 40], sizes = [8, 8], strides = [1, 1]} : vector<8x96xbf16> to vector<8x8xbf16>
    %252 = vector.extract_strided_slice %240 {offsets = [0, 48], sizes = [8, 8], strides = [1, 1]} : vector<8x96xbf16> to vector<8x8xbf16>
    %253 = vector.extract_strided_slice %240 {offsets = [0, 56], sizes = [8, 8], strides = [1, 1]} : vector<8x96xbf16> to vector<8x8xbf16>
    %254 = vector.shape_cast %250 : vector<8x8xbf16> to vector<1x8x8xbf16>
    %255 = vector.shape_cast %251 : vector<8x8xbf16> to vector<1x8x8xbf16>
    %256 = vector.shape_cast %252 : vector<8x8xbf16> to vector<1x8x8xbf16>
    %257 = vector.shape_cast %253 : vector<8x8xbf16> to vector<1x8x8xbf16>
    %258 = tpu.concatenate %254, %255, %256, %257 in 0 : vector<1x8x8xbf16>, vector<1x8x8xbf16>, vector<1x8x8xbf16>, vector<1x8x8xbf16> -> vector<4x8x8xbf16>
    %259 = vector.extract_strided_slice %240 {offsets = [0, 64], sizes = [8, 8], strides = [1, 1]} : vector<8x96xbf16> to vector<8x8xbf16>
    %260 = vector.extract_strided_slice %240 {offsets = [0, 72], sizes = [8, 8], strides = [1, 1]} : vector<8x96xbf16> to vector<8x8xbf16>
    %261 = vector.extract_strided_slice %240 {offsets = [0, 80], sizes = [8, 8], strides = [1, 1]} : vector<8x96xbf16> to vector<8x8xbf16>
    %262 = vector.extract_strided_slice %240 {offsets = [0, 88], sizes = [8, 8], strides = [1, 1]} : vector<8x96xbf16> to vector<8x8xbf16>
    %263 = vector.shape_cast %259 : vector<8x8xbf16> to vector<1x8x8xbf16>
    %264 = vector.shape_cast %260 : vector<8x8xbf16> to vector<1x8x8xbf16>
    %265 = vector.shape_cast %261 : vector<8x8xbf16> to vector<1x8x8xbf16>
    %266 = vector.shape_cast %262 : vector<8x8xbf16> to vector<1x8x8xbf16>
    %267 = tpu.concatenate %263, %264, %265, %266 in 0 : vector<1x8x8xbf16>, vector<1x8x8xbf16>, vector<1x8x8xbf16>, vector<1x8x8xbf16> -> vector<4x8x8xbf16>
    "tpu.trace_start"() <{level = 10 : i32, message = "hsd,hkd->hsk"}> : () -> ()
    %cst_71 = arith.constant dense<0.000000e+00> : vector<4x8x8xf32>
    %268 = tpu.matmul %249, %258, %cst_71 {dimension_numbers = #tpu.dot_dimension_numbers<[2], [2], [1], [1], [0, 0, 0, 1, 1, 1], [0], [0]>} : vector<4x8x8xbf16>, vector<4x8x8xbf16>, vector<4x8x8xf32> -> vector<4x8x8xf32>
    "tpu.trace_stop"() : () -> ()
    %cst_72 = arith.constant 0.353553385 : f32
    %269 = vector.broadcast %cst_72 : f32 to vector<4x8x8xf32>
    %270 = arith.mulf %268, %269 : vector<4x8x8xf32>
    %c0_73 = arith.constant 0 : index
    %c0_74 = arith.constant 0 : index
    %c0_75 = arith.constant 0 : index
    %271 = vector.load %arg1[%c0_73, %c0_74, %c0_75] : memref<2x1x8xf32, #tpu.memory_space<vmem>>, vector<1x1x8xf32>
    %272 = vector.shape_cast %271 : vector<1x1x8xf32> to vector<1x8xf32>
    %273 = vector.shape_cast %272 : vector<1x8xf32> to vector<1x1x8xf32>
    %274 = vector.broadcast %273 : vector<1x1x8xf32> to vector<4x8x8xf32>
    %275 = arith.addf %270, %274 : vector<4x8x8xf32>
    %cst_76 = arith.constant dense<0xFF800000> : vector<4x8xf32>
    %276 = vector.multi_reduction <maximumf>, %275, %cst_76 [2] : vector<4x8x8xf32> to vector<4x8xf32>
    %277 = vector.shape_cast %276 : vector<4x8xf32> to vector<4x8x1xf32>
    %278 = vector.broadcast %277 : vector<4x8x1xf32> to vector<4x8x8xf32>
    %279 = arith.subf %275, %278 : vector<4x8x8xf32>
    %280 = math.exp %279 : vector<4x8x8xf32>
    %cst_77 = arith.constant dense<0.000000e+00> : vector<4x8xf32>
    %281 = vector.multi_reduction <add>, %280, %cst_77 [2] : vector<4x8x8xf32> to vector<4x8xf32>
    %282 = vector.shape_cast %281 : vector<4x8xf32> to vector<4x8x1xf32>
    %283 = tpu.reciprocal %282 {approx = true} : vector<4x8x1xf32> -> vector<4x8x1xf32>
    %284 = vector.broadcast %283 : vector<4x8x1xf32> to vector<4x8x8xf32>
    %285 = arith.mulf %280, %284 : vector<4x8x8xf32>
    %286 = arith.truncf %285 : vector<4x8x8xf32> to vector<4x8x8xbf16>
    "tpu.trace_start"() <{level = 10 : i32, message = "hsk,hkd->hsd"}> : () -> ()
    %cst_78 = arith.constant dense<0.000000e+00> : vector<4x8x8xf32>
    %287 = tpu.matmul %286, %267, %cst_78 {dimension_numbers = #tpu.dot_dimension_numbers<[2], [1], [1], [2], [0, 0, 0, 1, 1, 2], [0], [0]>} : vector<4x8x8xbf16>, vector<4x8x8xbf16>, vector<4x8x8xf32> -> vector<4x8x8xf32>
    "tpu.trace_stop"() : () -> ()
    %288 = vector.extract_strided_slice %287 {offsets = [0, 0, 0], sizes = [1, 8, 8], strides = [1, 1, 1]} : vector<4x8x8xf32> to vector<1x8x8xf32>
    %289 = vector.shape_cast %288 : vector<1x8x8xf32> to vector<8x8xf32>
    %290 = vector.extract_strided_slice %287 {offsets = [1, 0, 0], sizes = [1, 8, 8], strides = [1, 1, 1]} : vector<4x8x8xf32> to vector<1x8x8xf32>
    %291 = vector.shape_cast %290 : vector<1x8x8xf32> to vector<8x8xf32>
    %292 = vector.extract_strided_slice %287 {offsets = [2, 0, 0], sizes = [1, 8, 8], strides = [1, 1, 1]} : vector<4x8x8xf32> to vector<1x8x8xf32>
    %293 = vector.shape_cast %292 : vector<1x8x8xf32> to vector<8x8xf32>
    %294 = vector.extract_strided_slice %287 {offsets = [3, 0, 0], sizes = [1, 8, 8], strides = [1, 1, 1]} : vector<4x8x8xf32> to vector<1x8x8xf32>
    %295 = vector.shape_cast %294 : vector<1x8x8xf32> to vector<8x8xf32>
    %296 = tpu.concatenate %289, %291, %293, %295 in 1 : vector<8x8xf32>, vector<8x8xf32>, vector<8x8xf32>, vector<8x8xf32> -> vector<8x32xf32>
    %297 = vector.extract_strided_slice %239 {offsets = [8, 0], sizes = [8, 96], strides = [1, 1]} : vector<16x96xbf16> to vector<8x96xbf16>
    %298 = vector.extract_strided_slice %297 {offsets = [0, 0], sizes = [8, 8], strides = [1, 1]} : vector<8x96xbf16> to vector<8x8xbf16>
    %299 = vector.extract_strided_slice %297 {offsets = [0, 8], sizes = [8, 8], strides = [1, 1]} : vector<8x96xbf16> to vector<8x8xbf16>
    %300 = vector.extract_strided_slice %297 {offsets = [0, 16], sizes = [8, 8], strides = [1, 1]} : vector<8x96xbf16> to vector<8x8xbf16>
    %301 = vector.extract_strided_slice %297 {offsets = [0, 24], sizes = [8, 8], strides = [1, 1]} : vector<8x96xbf16> to vector<8x8xbf16>
    %302 = vector.shape_cast %298 : vector<8x8xbf16> to vector<1x8x8xbf16>
    %303 = vector.shape_cast %299 : vector<8x8xbf16> to vector<1x8x8xbf16>
    %304 = vector.shape_cast %300 : vector<8x8xbf16> to vector<1x8x8xbf16>
    %305 = vector.shape_cast %301 : vector<8x8xbf16> to vector<1x8x8xbf16>
    %306 = tpu.concatenate %302, %303, %304, %305 in 0 : vector<1x8x8xbf16>, vector<1x8x8xbf16>, vector<1x8x8xbf16>, vector<1x8x8xbf16> -> vector<4x8x8xbf16>
    %307 = vector.extract_strided_slice %297 {offsets = [0, 32], sizes = [8, 8], strides = [1, 1]} : vector<8x96xbf16> to vector<8x8xbf16>
    %308 = vector.extract_strided_slice %297 {offsets = [0, 40], sizes = [8, 8], strides = [1, 1]} : vector<8x96xbf16> to vector<8x8xbf16>
    %309 = vector.extract_strided_slice %297 {offsets = [0, 48], sizes = [8, 8], strides = [1, 1]} : vector<8x96xbf16> to vector<8x8xbf16>
    %310 = vector.extract_strided_slice %297 {offsets = [0, 56], sizes = [8, 8], strides = [1, 1]} : vector<8x96xbf16> to vector<8x8xbf16>
    %311 = vector.shape_cast %307 : vector<8x8xbf16> to vector<1x8x8xbf16>
    %312 = vector.shape_cast %308 : vector<8x8xbf16> to vector<1x8x8xbf16>
    %313 = vector.shape_cast %309 : vector<8x8xbf16> to vector<1x8x8xbf16>
    %314 = vector.shape_cast %310 : vector<8x8xbf16> to vector<1x8x8xbf16>
    %315 = tpu.concatenate %311, %312, %313, %314 in 0 : vector<1x8x8xbf16>, vector<1x8x8xbf16>, vector<1x8x8xbf16>, vector<1x8x8xbf16> -> vector<4x8x8xbf16>
    %316 = vector.extract_strided_slice %297 {offsets = [0, 64], sizes = [8, 8], strides = [1, 1]} : vector<8x96xbf16> to vector<8x8xbf16>
    %317 = vector.extract_strided_slice %297 {offsets = [0, 72], sizes = [8, 8], strides = [1, 1]} : vector<8x96xbf16> to vector<8x8xbf16>
    %318 = vector.extract_strided_slice %297 {offsets = [0, 80], sizes = [8, 8], strides = [1, 1]} : vector<8x96xbf16> to vector<8x8xbf16>
    %319 = vector.extract_strided_slice %297 {offsets = [0, 88], sizes = [8, 8], strides = [1, 1]} : vector<8x96xbf16> to vector<8x8xbf16>
    %320 = vector.shape_cast %316 : vector<8x8xbf16> to vector<1x8x8xbf16>
    %321 = vector.shape_cast %317 : vector<8x8xbf16> to vector<1x8x8xbf16>
    %322 = vector.shape_cast %318 : vector<8x8xbf16> to vector<1x8x8xbf16>
    %323 = vector.shape_cast %319 : vector<8x8xbf16> to vector<1x8x8xbf16>
    %324 = tpu.concatenate %320, %321, %322, %323 in 0 : vector<1x8x8xbf16>, vector<1x8x8xbf16>, vector<1x8x8xbf16>, vector<1x8x8xbf16> -> vector<4x8x8xbf16>
    "tpu.trace_start"() <{level = 10 : i32, message = "hsd,hkd->hsk"}> : () -> ()
    %cst_79 = arith.constant dense<0.000000e+00> : vector<4x8x8xf32>
    %325 = tpu.matmul %306, %315, %cst_79 {dimension_numbers = #tpu.dot_dimension_numbers<[2], [2], [1], [1], [0, 0, 0, 1, 1, 1], [0], [0]>} : vector<4x8x8xbf16>, vector<4x8x8xbf16>, vector<4x8x8xf32> -> vector<4x8x8xf32>
    "tpu.trace_stop"() : () -> ()
    %cst_80 = arith.constant 0.353553385 : f32
    %326 = vector.broadcast %cst_80 : f32 to vector<4x8x8xf32>
    %327 = arith.mulf %325, %326 : vector<4x8x8xf32>
    %c1_81 = arith.constant 1 : index
    %c0_82 = arith.constant 0 : index
    %c0_83 = arith.constant 0 : index
    %328 = vector.load %arg1[%c1_81, %c0_82, %c0_83] : memref<2x1x8xf32, #tpu.memory_space<vmem>>, vector<1x1x8xf32>
    %329 = vector.shape_cast %328 : vector<1x1x8xf32> to vector<1x8xf32>
    %330 = vector.shape_cast %329 : vector<1x8xf32> to vector<1x1x8xf32>
    %331 = vector.broadcast %330 : vector<1x1x8xf32> to vector<4x8x8xf32>
    %332 = arith.addf %327, %331 : vector<4x8x8xf32>
    %cst_84 = arith.constant dense<0xFF800000> : vector<4x8xf32>
    %333 = vector.multi_reduction <maximumf>, %332, %cst_84 [2] : vector<4x8x8xf32> to vector<4x8xf32>
    %334 = vector.shape_cast %333 : vector<4x8xf32> to vector<4x8x1xf32>
    %335 = vector.broadcast %334 : vector<4x8x1xf32> to vector<4x8x8xf32>
    %336 = arith.subf %332, %335 : vector<4x8x8xf32>
    %337 = math.exp %336 : vector<4x8x8xf32>
    %cst_85 = arith.constant dense<0.000000e+00> : vector<4x8xf32>
    %338 = vector.multi_reduction <add>, %337, %cst_85 [2] : vector<4x8x8xf32> to vector<4x8xf32>
    %339 = vector.shape_cast %338 : vector<4x8xf32> to vector<4x8x1xf32>
    %340 = tpu.reciprocal %339 {approx = true} : vector<4x8x1xf32> -> vector<4x8x1xf32>
    %341 = vector.broadcast %340 : vector<4x8x1xf32> to vector<4x8x8xf32>
    %342 = arith.mulf %337, %341 : vector<4x8x8xf32>
    %343 = arith.truncf %342 : vector<4x8x8xf32> to vector<4x8x8xbf16>
    "tpu.trace_start"() <{level = 10 : i32, message = "hsk,hkd->hsd"}> : () -> ()
    %cst_86 = arith.constant dense<0.000000e+00> : vector<4x8x8xf32>
    %344 = tpu.matmul %343, %324, %cst_86 {dimension_numbers = #tpu.dot_dimension_numbers<[2], [1], [1], [2], [0, 0, 0, 1, 1, 2], [0], [0]>} : vector<4x8x8xbf16>, vector<4x8x8xbf16>, vector<4x8x8xf32> -> vector<4x8x8xf32>
    "tpu.trace_stop"() : () -> ()
    %345 = vector.extract_strided_slice %344 {offsets = [0, 0, 0], sizes = [1, 8, 8], strides = [1, 1, 1]} : vector<4x8x8xf32> to vector<1x8x8xf32>
    %346 = vector.shape_cast %345 : vector<1x8x8xf32> to vector<8x8xf32>
    %347 = vector.extract_strided_slice %344 {offsets = [1, 0, 0], sizes = [1, 8, 8], strides = [1, 1, 1]} : vector<4x8x8xf32> to vector<1x8x8xf32>
    %348 = vector.shape_cast %347 : vector<1x8x8xf32> to vector<8x8xf32>
    %349 = vector.extract_strided_slice %344 {offsets = [2, 0, 0], sizes = [1, 8, 8], strides = [1, 1, 1]} : vector<4x8x8xf32> to vector<1x8x8xf32>
    %350 = vector.shape_cast %349 : vector<1x8x8xf32> to vector<8x8xf32>
    %351 = vector.extract_strided_slice %344 {offsets = [3, 0, 0], sizes = [1, 8, 8], strides = [1, 1, 1]} : vector<4x8x8xf32> to vector<1x8x8xf32>
    %352 = vector.shape_cast %351 : vector<1x8x8xf32> to vector<8x8xf32>
    %353 = tpu.concatenate %346, %348, %350, %352 in 1 : vector<8x8xf32>, vector<8x8xf32>, vector<8x8xf32>, vector<8x8xf32> -> vector<8x32xf32>
    %354 = tpu.concatenate %296, %353 in 0 : vector<8x32xf32>, vector<8x32xf32> -> vector<16x32xf32>
    %355 = arith.truncf %354 : vector<16x32xf32> to vector<16x32xbf16>
    %c1_87 = arith.constant 1 : index
    %c0_88 = arith.constant 0 : index
    %c0_89 = arith.constant 0 : index
    %356 = vector.load %arg4[%c1_87, %c0_88, %c0_89] : memref<2x32x32xbf16, #tpu.memory_space<vmem>>, vector<1x32x32xbf16>
    %357 = vector.shape_cast %356 : vector<1x32x32xbf16> to vector<32x32xbf16>
    %cst_90 = arith.constant dense<0.000000e+00> : vector<16x32xf32>
    %358 = tpu.matmul %355, %357, %cst_90 {dimension_numbers = #tpu.dot_dimension_numbers<[1], [0], [0], [1], [0, 0, 1, 1], [], []>} : vector<16x32xbf16>, vector<32x32xbf16>, vector<16x32xf32> -> vector<16x32xf32>
    %359 = vector.extract_strided_slice %228 {offsets = [0, 0], sizes = [1, 32], strides = [1, 1]} : vector<6x32xf32> to vector<1x32xf32>
    %360 = vector.broadcast %359 : vector<1x32xf32> to vector<16x32xf32>
    %361 = arith.addf %358, %360 : vector<16x32xf32>
    %362 = arith.addf %361, %226 : vector<16x32xf32>
    %363 = vector.extract_strided_slice %228 {offsets = [1, 0], sizes = [1, 32], strides = [1, 1]} : vector<6x32xf32> to vector<1x32xf32>
    %364 = vector.extract_strided_slice %228 {offsets = [2, 0], sizes = [1, 32], strides = [1, 1]} : vector<6x32xf32> to vector<1x32xf32>
    %cst_91 = arith.constant dense<0.000000e+00> : vector<16xf32>
    %365 = vector.multi_reduction <add>, %362, %cst_91 [1] : vector<16x32xf32> to vector<16xf32>
    %366 = vector.shape_cast %365 : vector<16xf32> to vector<16x1xf32>
    %cst_92 = arith.constant 3.200000e+01 : f32
    %367 = vector.broadcast %cst_92 : f32 to vector<16x1xf32>
    %368 = arith.divf %366, %367 : vector<16x1xf32>
    %369 = vector.broadcast %368 : vector<16x1xf32> to vector<16x32xf32>
    %370 = arith.subf %362, %369 : vector<16x32xf32>
    %371 = arith.mulf %370, %370 : vector<16x32xf32>
    %cst_93 = arith.constant dense<0.000000e+00> : vector<16xf32>
    %372 = vector.multi_reduction <add>, %371, %cst_93 [1] : vector<16x32xf32> to vector<16xf32>
    %373 = vector.shape_cast %372 : vector<16xf32> to vector<16x1xf32>
    %cst_94 = arith.constant 3.200000e+01 : f32
    %374 = vector.broadcast %cst_94 : f32 to vector<16x1xf32>
    %375 = arith.divf %373, %374 : vector<16x1xf32>
    %cst_95 = arith.constant 9.99999996E-13 : f32
    %376 = vector.broadcast %cst_95 : f32 to vector<16x1xf32>
    %377 = arith.addf %375, %376 : vector<16x1xf32>
    %378 = math.rsqrt %377 : vector<16x1xf32>
    %379 = vector.broadcast %378 : vector<16x1xf32> to vector<16x32xf32>
    %380 = arith.mulf %370, %379 : vector<16x32xf32>
    %381 = vector.broadcast %363 : vector<1x32xf32> to vector<16x32xf32>
    %382 = arith.mulf %380, %381 : vector<16x32xf32>
    %383 = vector.broadcast %364 : vector<1x32xf32> to vector<16x32xf32>
    %384 = arith.addf %382, %383 : vector<16x32xf32>
    %385 = arith.truncf %384 : vector<16x32xf32> to vector<16x32xbf16>
    %c1_96 = arith.constant 1 : index
    %c0_97 = arith.constant 0 : index
    %c0_98 = arith.constant 0 : index
    %386 = vector.load %arg5[%c1_96, %c0_97, %c0_98] : memref<2x32x64xbf16, #tpu.memory_space<vmem>>, vector<1x32x64xbf16>
    %387 = vector.shape_cast %386 : vector<1x32x64xbf16> to vector<32x64xbf16>
    %cst_99 = arith.constant dense<0.000000e+00> : vector<16x64xf32>
    %388 = tpu.matmul %385, %387, %cst_99 {dimension_numbers = #tpu.dot_dimension_numbers<[1], [0], [0], [1], [0, 0, 1, 1], [], []>} : vector<16x32xbf16>, vector<32x64xbf16>, vector<16x64xf32> -> vector<16x64xf32>
    %389 = vector.broadcast %232 : vector<1x64xf32> to vector<16x64xf32>
    %390 = arith.addf %388, %389 : vector<16x64xf32>
    %cst_100 = arith.constant 5.000000e-01 : f32
    %391 = vector.broadcast %cst_100 : f32 to vector<16x64xf32>
    %392 = arith.mulf %391, %390 : vector<16x64xf32>
    %cst_101 = arith.constant 0.707106769 : f32
    %393 = vector.broadcast %cst_101 : f32 to vector<16x64xf32>
    %394 = arith.mulf %390, %393 : vector<16x64xf32>
    %395 = math.erf %394 : vector<16x64xf32>
    %cst_102 = arith.constant 1.000000e+00 : f32
    %396 = vector.broadcast %cst_102 : f32 to vector<16x64xf32>
    %397 = arith.addf %396, %395 : vector<16x64xf32>
    %398 = arith.mulf %392, %397 : vector<16x64xf32>
    %399 = arith.truncf %398 : vector<16x64xf32> to vector<16x64xbf16>
    %c1_103 = arith.constant 1 : index
    %c0_104 = arith.constant 0 : index
    %c0_105 = arith.constant 0 : index
    %400 = vector.load %arg6[%c1_103, %c0_104, %c0_105] : memref<2x64x32xbf16, #tpu.memory_space<vmem>>, vector<1x64x32xbf16>
    %401 = vector.shape_cast %400 : vector<1x64x32xbf16> to vector<64x32xbf16>
    %cst_106 = arith.constant dense<0.000000e+00> : vector<16x32xf32>
    %402 = tpu.matmul %399, %401, %cst_106 {dimension_numbers = #tpu.dot_dimension_numbers<[1], [0], [0], [1], [0, 0, 1, 1], [], []>} : vector<16x64xbf16>, vector<64x32xbf16>, vector<16x32xf32> -> vector<16x32xf32>
    %403 = vector.extract_strided_slice %228 {offsets = [3, 0], sizes = [1, 32], strides = [1, 1]} : vector<6x32xf32> to vector<1x32xf32>
    %404 = vector.broadcast %403 : vector<1x32xf32> to vector<16x32xf32>
    %405 = arith.addf %402, %404 : vector<16x32xf32>
    %406 = arith.addf %405, %384 : vector<16x32xf32>
    %407 = vector.extract_strided_slice %228 {offsets = [4, 0], sizes = [1, 32], strides = [1, 1]} : vector<6x32xf32> to vector<1x32xf32>
    %408 = vector.extract_strided_slice %228 {offsets = [5, 0], sizes = [1, 32], strides = [1, 1]} : vector<6x32xf32> to vector<1x32xf32>
    %cst_107 = arith.constant dense<0.000000e+00> : vector<16xf32>
    %409 = vector.multi_reduction <add>, %406, %cst_107 [1] : vector<16x32xf32> to vector<16xf32>
    %410 = vector.shape_cast %409 : vector<16xf32> to vector<16x1xf32>
    %cst_108 = arith.constant 3.200000e+01 : f32
    %411 = vector.broadcast %cst_108 : f32 to vector<16x1xf32>
    %412 = arith.divf %410, %411 : vector<16x1xf32>
    %413 = vector.broadcast %412 : vector<16x1xf32> to vector<16x32xf32>
    %414 = arith.subf %406, %413 : vector<16x32xf32>
    %415 = arith.mulf %414, %414 : vector<16x32xf32>
    %cst_109 = arith.constant dense<0.000000e+00> : vector<16xf32>
    %416 = vector.multi_reduction <add>, %415, %cst_109 [1] : vector<16x32xf32> to vector<16xf32>
    %417 = vector.shape_cast %416 : vector<16xf32> to vector<16x1xf32>
    %cst_110 = arith.constant 3.200000e+01 : f32
    %418 = vector.broadcast %cst_110 : f32 to vector<16x1xf32>
    %419 = arith.divf %417, %418 : vector<16x1xf32>
    %cst_111 = arith.constant 9.99999996E-13 : f32
    %420 = vector.broadcast %cst_111 : f32 to vector<16x1xf32>
    %421 = arith.addf %419, %420 : vector<16x1xf32>
    %422 = math.rsqrt %421 : vector<16x1xf32>
    %423 = vector.broadcast %422 : vector<16x1xf32> to vector<16x32xf32>
    %424 = arith.mulf %414, %423 : vector<16x32xf32>
    %425 = vector.broadcast %407 : vector<1x32xf32> to vector<16x32xf32>
    %426 = arith.mulf %424, %425 : vector<16x32xf32>
    %427 = vector.broadcast %408 : vector<1x32xf32> to vector<16x32xf32>
    %428 = arith.addf %426, %427 : vector<16x32xf32>
    %c0_112 = arith.constant 0 : index
    %c0_113 = arith.constant 0 : index
    %429 = vector.load %arg9[%c0_112, %c0_113] : memref<16x32xf32, #tpu.memory_space<vmem>>, vector<16x32xf32>
    tpu.vector_store %arg9[%c0_112, %c0_113], %428 {strides = array<i32>} : memref<16x32xf32, #tpu.memory_space<vmem>>, vector<16x32xf32>,
    return
  }
}

</mosaic_0001>

<bundles_post_ra>
// kernel: bert_qa_forward.1
= control target key start
LH: loop header
LB: loop body
LE: loop exit
PB: predicated region body
PF: predicated region fallthrough
CT: control target
= control target key end

     0   :  { %vm38_vm0 = vcmask 261120   ;;  %v3324_v15 = vmov 0.0   ;;  %vm3325_vm1 = vmmov 0   ;;  %v90_v34 = vlaneseq  ;;  %s3326_s21 = smov 112   ;;  %s3327_s22 = smov 120   ;;  %s4011_s0 = inlined_call_operand.vmem [shape: f32[16,32], index: 0, kind: input, shape index: {}]   ;;  %s4012_s3 = inlined_call_operand.vmem [shape: bf16[2,32,96], index: 3, kind: input, shape index: {}]   ;;  %s4013_s2 = inlined_call_operand.vmem [shape: f32[2,1,32], index: 2, kind: input, shape index: {}]   ;;  %s4014_s8 = inlined_call_operand.vmem [shape: f32[2,1,160], index: 8, kind: input, shape index: {}]   ;;  %s4015_s1 = inlined_call_operand.vmem [shape: f32[2,1,8], index: 1, kind: input, shape index: {}]   ;;  %s4016_s4 = inlined_call_operand.vmem [shape: bf16[2,32,32], index: 4, kind: input, shape index: {}]   ;;  %s4017_s7 = inlined_call_operand.vmem [shape: f32[2,6,32], index: 7, kind: input, shape index: {}]   ;;  %s4018_s5 = inlined_call_operand.vmem [shape: bf16[2,32,64], index: 5, kind: input, shape index: {}]   ;;  %s4019_s6 = inlined_call_operand.vmem [shape: bf16[2,64,32], index: 6, kind: input, shape index: {}]   ;;  %s4020_s9 = inlined_call_operand.vmem [shape: f32[16,32], index: 9, kind: output, shape index: {}]  }
   0x1   :  { %v33_v0 = vld [vmem:[%s4011_s0] sm:$0xff]  ;;  %v34_v1 = vld [vmem:[%s4011_s0 + $0x8] sm:$0xff]  ;;  %2907 = vmatprep.subr.bf16.mxu1 %v3324_v15  ;;  %2921 = vmatprep.subr.bf16.mxu0 %v3324_v15  ;;  %s3328_s23 = smov 104   ;;  %s3329_s24 = smov 96   ;;  %vm161_vm2 = vcmask 64512   ;;  %vm420_vm3 = vcmask 1043456  }
   0x2   :  { %v39_v2 = vsel %vm38_vm0, %v33_v0, 0.0  ;;  %v42_v3 = vsel %vm38_vm0, %v34_v1, 0.0  ;;  %v3212_v14 = vld [vmem:[%s4012_s3] sm:$0xff]   ;;  %v3213_v16 = vld [vmem:[%s4012_s3 + $0x8] sm:$0xff]   ;;  %2911 = vmatprep.mubr.msk.bf16.mxu1 %vm3325_vm1, %v3324_v15  ;;  %2923 = vmatprep.mubr.msk.bf16.mxu0 %vm3325_vm1, %v3324_v15  ;;  %v3424_v35 = vshrl.u32 %v90_v34, 7  ;;  %s3330_s27 = smov 64  }
   0x3   :  { %40 = vadd.xlane.f32.xlu0 %v39_v2  ;;  %2908 = vmatpush3.bf16.msra.mxu1 %v3212_v14  ;;  %v2725_v25 = vld [vmem:[%s4013_s2] ss:$0 sm:$0xff]  ;;  %v2726_v29 = vld [vmem:[%s4013_s2 + $0x1] ss:$0 sm:$0xff]  ;;  %s3331_s0 = smov 8   ;;  %s3332_s13 = smov 16  }
   0x4   :  { %2909 = vmatprep.subr.bf16.mxu1 %v3324_v15  ;;  %v3427_v36 = vsub.s32 0, %v3424_v35  ;;  %v3432_v37 = vld [vmem:[%s4014_s8] sm:$0x3]  ;;  %s3333_s14 = smov 24   ;;  %vm621_vm4 = vcmask 130048   ;;  %vm623_vm5 = vcmask 195584  }
   0x5   :  { %v2734_v58 = vld [vmem:[%s4015_s1] ss:$0 sm:$0xff]  ;;  %s3334_s20 = smov 32   ;;  %vm1315_vm6 = vcmask 523264  }
   0x6   :  { %v3436_v38 = vrot.slane %v3432_v37, %v3427_v36 }
   0x7   :  { %43 = vadd.xlane.f32.xlu0 %v42_v3  ;;  %2910 = vmatpush3.bf16.msra.mxu1 %v3213_v16 }
   0x8   :  { %2915 = vmatprep.subr.bf16.mxu1 %v3324_v15 }
  0x90   :  { %v41_v4 = vpop.xlane.xlu0 %40 }
  0x91   :  { %v46_v5 = vmul.f32 0.03125, %v41_v4 }
  0x93   :  { %v48_v6 = vsub.f32 %v33_v0, %v46_v5 }
  0x94   :  { %v44_v7 = vpop.xlane.xlu0 %43 }
  0x95   :  { %v47_v8 = vmul.f32 0.03125, %v44_v7  ;;  %v50_v9 = vmul.f32 %v48_v6, %v48_v6 }
  0x97   :  { %v49_v10 = vsub.f32 %v34_v1, %v47_v8  ;;  %v52_v11 = vsel %vm38_vm0, %v50_v9, 0.0 }
  0x98   :  { %53 = vadd.xlane.f32.xlu1 %v52_v11 }
  0x99   :  { %v51_v12 = vmul.f32 %v49_v10, %v49_v10 }
  0x9b   :  { %v55_v13 = vsel %vm38_vm0, %v51_v12, 0.0 }
  0x9c   :  { %56 = vadd.xlane.f32.xlu1 %v55_v13 }
 0x125   :  { %v54_v17 = vpop.xlane.xlu1 %53 }
 0x126   :  { %v58_v18 = vmul.f32 0.03125, %v54_v17 }
 0x128   :  { %v60_v19 = vadd.f32 1e-12, %v58_v18 }
 0x129   :  { %v57_v20 = vpop.xlane.xlu1 %56 }
 0x12a   :  { %3232 = vrsqrt.f32 %v60_v19  ;;  %v59_v21 = vmul.f32 0.03125, %v57_v20 }
 0x12c   :  { %v61_v22 = vadd.f32 1e-12, %v59_v21 }
 0x12e   :  { %3234 = vrsqrt.f32 %v61_v22 }
 0x134   :  { %v3233_v23 = vpop.eup %3232 }
 0x135   :  { %v64_v24 = vmul.f32 %v3233_v23, %v48_v6 }
 0x137   :  { %v72_v28 = vmul.f32 %v2725_v25, %v64_v24 }
 0x138   :  { %v3235_v26 = vpop.eup %3234 }
 0x139   :  { %v65_v27 = vmul.f32 %v3235_v26, %v49_v10  ;;  %v3415_v31 = vadd.f32 %v2726_v29, %v72_v28 }
 0x13b   :  { %v73_v30 = vmul.f32 %v2725_v25, %v65_v27 }
 0x13d   :  { %v3417_v32 = vadd.f32 %v2726_v29, %v73_v30 }
 0x13f   :  { %v84_v33 = vpack.c.bf16 %v3417_v32, %v3415_v31 }
 0x141   :  { %2912 = vmatmul.mubr.msk.bf16.vlgmr.msra.gmra.mrb[0].mxu1 %vm38_vm0, %v84_v33 }
 0x142   :  { %2917 = vmatprep.mubr.msk.bf16.mxu1 %vm3325_vm1, %v3324_v15 }
 0x214   :  { %v144_v39 = vpop.f32.mrb[0].mxu1 }
 0x215   :  { %v2913_v40 = vpop.f32.mrb[1].mxu1  ;;  %v145_v42 = vadd.f32 %v144_v39, %v3436_v38 }
 0x216   :  { %v147_v41 = vpop.f32.mrb[2].mxu1 }
 0x217   :  { %v148_v43 = vadd.f32 %v147_v41, %v3436_v38  ;;  %v2914_v44 = vpop.f32.mrb[3].mxu1 }
 0x219   :  { %v3440_v45 = vpack.c.bf16 %v148_v43, %v145_v42 }
 0x21b   :  { %155 = vrot.lane.b32.xlu1 %v3440_v45, %s3326_s21  ;;  %153 = vrot.lane.b32.xlu0 %v3440_v45, %s3327_s22 }
 0x21f   :  { %157 = vrot.lane.b32.xlu1 %v3440_v45, %s3328_s23 }
 0x223   :  { %159 = vrot.lane.b32.xlu1 %v3440_v45, %s3329_s24 }
 0x28d   :  { %v3450_v46 = vpop.permute.xlu1 %155  ;;  %v3452_v47 = vpop.permute.xlu0 %153 }
 0x28e   :  { %256 = vrot.lane.b32.xlu1 %v3450_v46, %s3329_s24  ;;  %208 = vrot.lane.b32.xlu0 %v3452_v47, %s3329_s24 }
 0x291   :  { %v3458_v48 = vpop.permute.xlu1 %157 }
 0x292   :  { %304 = vrot.lane.b32.xlu0 %v3458_v48, %s3329_s24 }
 0x295   :  { %v160_v49 = vpop.permute.xlu1 %159 }
 0x296   :  { %v166_v50 = vsel %vm161_vm2, %v160_v49, 0 }
 0x297   :  { %2916 = vmatpush3.bf16.xpose.msra.mxu1 %v166_v50  ;;  %v3505_v50 = vrot.slane %v3440_v45, 4 }
 0x298   :  { %2927 = vmatprep.subr.bf16.mxu1 %v3324_v15 }
 0x29e   :  { %2918 = vmatmul.mubr.msk.bf16.vlgmr.msra.gmra.mrb[4].mxu1 %vm161_vm2, %v3440_v45 }
 0x29f   :  { %2929 = vmatprep.mubr.msk.bf16.mxu1 %vm3325_vm1, %v3324_v15 }
 0x300   :  { %v257_v51 = vpop.permute.xlu1 %256  ;;  %v209_v52 = vpop.permute.xlu0 %208 }
 0x301   :  { %v262_v53 = vsel %vm161_vm2, %v257_v51, 0  ;;  %v214_v54 = vsel %vm161_vm2, %v209_v52, 0  ;;  %v3512_v51 = vrot.slane %v3450_v46, 4 }
 0x302   :  { %2922 = vmatpush3.bf16.xpose.msra.mxu0 %v214_v54  ;;  %2928 = vmatpush3.bf16.xpose.msra.mxu1 %v262_v53 }
 0x303   :  { %2933 = vmatprep.subr.bf16.mxu0 %v3324_v15  ;;  %2939 = vmatprep.subr.bf16.mxu1 %v3324_v15 }
 0x304   :  { %v305_v55 = vpop.permute.xlu0 %304 }
 0x305   :  { %v310_v56 = vsel %vm161_vm2, %v305_v55, 0 }
 0x309   :  { %2924 = vmatmul.mubr.msk.bf16.vlgmr.msra.gmra.mrb[0].mxu0 %vm161_vm2, %v3452_v47  ;;  %2930 = vmatmul.mubr.msk.bf16.vlgmr.msra.gmra.mrb[8].mxu1 %vm161_vm2, %v3450_v46 }
 0x30a   :  { %2934 = vmatpush3.bf16.xpose.msra.mxu0 %v310_v56  ;;  %2935 = vmatprep.mubr.msk.bf16.mxu0 %vm3325_vm1, %v3324_v15 }
 0x30b   :  { %2941 = vmatprep.mubr.msk.bf16.mxu1 %vm3325_vm1, %v3324_v15  ;;  %2945 = vmatprep.subr.bf16.mxu0 %v3324_v15 }
 0x311   :  { %2936 = vmatmul.mubr.msk.bf16.vlgmr.msra.gmra.mrb[4].mxu0 %vm161_vm2, %v3458_v48 }
 0x312   :  { %2947 = vmatprep.mubr.msk.bf16.mxu0 %vm3325_vm1, %v3324_v15 }
 0x371   :  { %v202_v57 = vpop.f32.mrb[4].mxu1 }
 0x372   :  { %v352_v59 = vmul.f32 0.35355338, %v202_v57  ;;  %v2919_v60 = vpop.f32.mrb[5].mxu1 }
 0x373   :  { %v205_v61 = vpop.f32.mrb[6].mxu1 }
 0x374   :  { %v2920_v62 = vpop.f32.mrb[7].mxu1  ;;  %v363_v63 = vadd.f32 %v2734_v58, %v352_v59  ;;  %v3523_v61 = vrot.slane %v3452_v47, 4 }
 0x375   :  { %v3528_v62 = vrot.slane %v3458_v48, 4 }
 0x376   :  { %v367_v0 = vsel %vm161_vm2, %v363_v63, -inf }
 0x377   :  { %368 = vmax.xlane.f32.xlu1 %v367_v0 }
 0x388   :  { %415 = vrot.lane.b32.xlu1 %v3440_v45, %s3330_s27 }
 0x3dc   :  { %v250_v1 = vpop.f32.mrb[0].mxu0  ;;  %v298_v2 = vpop.f32.mrb[8].mxu1 }
 0x3dd   :  { %v353_v3 = vmul.f32 0.35355338, %v250_v1  ;;  %v354_v4 = vmul.f32 0.35355338, %v298_v2  ;;  %v2925_v5 = vpop.f32.mrb[1].mxu0  ;;  %v2931_v6 = vpop.f32.mrb[9].mxu1 }
 0x3de   :  { %v253_v7 = vpop.f32.mrb[2].mxu0  ;;  %v301_v8 = vpop.f32.mrb[10].mxu1 }
 0x3df   :  { %v2926_v9 = vpop.f32.mrb[3].mxu0  ;;  %v2932_v10 = vpop.f32.mrb[11].mxu1  ;;  %v364_v11 = vadd.f32 %v2734_v58, %v353_v3  ;;  %v365_v13 = vadd.f32 %v2734_v58, %v354_v4 }
 0x3e1   :  { %v370_v12 = vsel %vm161_vm2, %v364_v11, -inf  ;;  %v373_v18 = vsel %vm161_vm2, %v365_v13, -inf }
 0x3e2   :  { %371 = vmax.xlane.f32.xlu0 %v370_v12 }
 0x3e4   :  { %v346_v14 = vpop.f32.mrb[4].mxu0 }
 0x3e5   :  { %v355_v16 = vmul.f32 0.35355338, %v346_v14  ;;  %v2937_v17 = vpop.f32.mrb[5].mxu0 }
 0x3e6   :  { %v349_v19 = vpop.f32.mrb[6].mxu0  ;;  %374 = vmax.xlane.f32.xlu0 %v373_v18 }
 0x3e7   :  { %v2938_v20 = vpop.f32.mrb[7].mxu0  ;;  %v366_v21 = vadd.f32 %v2734_v58, %v355_v16 }
 0x3e9   :  { %v376_v22 = vsel %vm161_vm2, %v366_v21, -inf }
 0x3ea   :  { %377 = vmax.xlane.f32.xlu0 %v376_v22 }
 0x404   :  { %v369_v23 = vpop.xlane.xlu1 %368 }
 0x405   :  { %v379_v24 = vsub.f32 %v363_v63, %v369_v23 }
 0x407   :  { %v383_v25 = vmul.f32 1.442695, %v379_v24 }
 0x408   :  { %v416_v26 = vpop.permute.xlu1 %415 }
 0x409   :  { %3236 = vpow2.f32 %v383_v25  ;;  %v422_v27 = vsel %vm420_vm3, %v416_v26, 0 }
 0x40a   :  { %2940 = vmatpush3.bf16.msra.mxu1 %v422_v27 }
 0x40b   :  { %2951 = vmatprep.subr.bf16.mxu1 %v3324_v15 }
 0x413   :  { %v3237_v28 = vpop.eup %3236 }
 0x414   :  { %v391_v29 = vsel %vm161_vm2, %v3237_v28, 0.0 }
 0x415   :  { %392 = vadd.xlane.f32.xlu1 %v391_v29 }
 0x426   :  { %512 = vrot.lane.b32.xlu1 %v3450_v46, %s3330_s27 }
 0x42a   :  { %560 = vrot.lane.b32.xlu1 %v3458_v48, %s3330_s27 }
 0x46f   :  { %v372_v30 = vpop.xlane.xlu0 %371 }
 0x470   :  { %v380_v33 = vsub.f32 %v364_v11, %v372_v30 }
 0x472   :  { %v385_v34 = vmul.f32 1.442695, %v380_v33 }
 0x473   :  { %v375_v39 = vpop.xlane.xlu0 %374 }
 0x474   :  { %3238 = vpow2.f32 %v385_v34  ;;  %v381_v40 = vsub.f32 %v365_v13, %v375_v39 }
 0x476   :  { %v387_v41 = vmul.f32 1.442695, %v381_v40 }
 0x477   :  { %v378_v52 = vpop.xlane.xlu0 %377 }
 0x478   :  { %3240 = vpow2.f32 %v387_v41  ;;  %v382_v53 = vsub.f32 %v366_v21, %v378_v52  ;;  %v2744_v41 = vld [vmem:[%s4015_s1 + $0x1] ss:$0 sm:$0xff] }
 0x47a   :  { %v389_v55 = vmul.f32 1.442695, %v382_v53 }
 0x47e   :  { %v3239_v42 = vpop.eup %3238 }
 0x47f   :  { %v394_v43 = vsel %vm161_vm2, %v3239_v42, 0.0 }
 0x480   :  { %395 = vadd.xlane.f32.xlu0 %v394_v43 }
 0x482   :  { %v3241_v44 = vpop.eup %3240 }
 0x483   :  { %v397_v49 = vsel %vm161_vm2, %v3241_v44, 0.0 }
 0x484   :  { %398 = vadd.xlane.f32.xlu1 %v397_v49 }
 0x495   :  { %626 = vrot.lane.b32.xlu1 %v3505_v50, %s3329_s24 }
 0x496   :  { %464 = vrot.lane.b32.xlu0 %v3452_v47, %s3330_s27 }
 0x499   :  { %724 = vrot.lane.b32.xlu1 %v3512_v51, %s3329_s24 }
 0x4a2   :  { %v393_v54 = vpop.xlane.xlu1 %392 }
 0x4a3   :  { %3242 = vrcp.f32 %v393_v54 }
 0x4a4   :  { %3244 = vpow2.f32 %v389_v55 }
 0x4a6   :  { %v513_v57 = vpop.permute.xlu1 %512 }
 0x4a7   :  { %v518_v60 = vsel %vm420_vm3, %v513_v57, 0 }
 0x4aa   :  { %v561_v63 = vpop.permute.xlu1 %560 }
 0x4ab   :  { %v566_v48 = vsel %vm420_vm3, %v561_v63, 0 }
 0x4ad   :  { %v3243_v45 = vpop.eup %3242 }
 0x4ae   :  { %v407_v56 = vmul.f32 %v3243_v45, %v3237_v28  ;;  %v3245_v59 = vpop.eup %3244 }
 0x4af   :  { %v400_v46 = vsel %vm161_vm2, %v3245_v59, 0.0 }
 0x4b0   :  { %v411_v58 = vpack.c.bf16 %v407_v56, %v407_v56 }
 0x4b2   :  { %2942 = vmatmul.mubr.msk.bf16.vlgmr.msra.gmra.mrb[12].mxu1 %vm161_vm2, %v411_v58 }
 0x4b3   :  { %2952 = vmatpush3.bf16.msra.mxu1 %v518_v60  ;;  %2953 = vmatprep.mubr.msk.bf16.mxu1 %vm3325_vm1, %v3324_v15 }
 0x4b4   :  { %2963 = vmatprep.subr.bf16.mxu1 %v3324_v15 }
 0x4b5   :  { %401 = vadd.xlane.f32.xlu0 %v400_v46 }
 0x4cb   :  { %675 = vrot.lane.b32.xlu0 %v3523_v61, %s3329_s24 }
 0x4cf   :  { %773 = vrot.lane.b32.xlu0 %v3528_v62, %s3329_s24 }
 0x50d   :  { %v396_v0 = vpop.xlane.xlu0 %395 }
 0x50e   :  { %3246 = vrcp.f32 %v396_v0 }
 0x511   :  { %v399_v1 = vpop.xlane.xlu1 %398  ;;  %v465_v2 = vpop.permute.xlu0 %464 }
 0x512   :  { %3248 = vrcp.f32 %v399_v1  ;;  %v470_v3 = vsel %vm420_vm3, %v465_v2, 0 }
 0x513   :  { %2946 = vmatpush3.bf16.msra.mxu0 %v470_v3 }
 0x514   :  { %2957 = vmatprep.subr.bf16.mxu0 %v3324_v15 }
 0x515   :  { %v627_v8 = vpop.permute.xlu1 %626 }
 0x516   :  { %v632_v10 = vsel %vm161_vm2, %v627_v8, 0 }
 0x518   :  { %v3247_v47 = vpop.eup %3246 }
 0x519   :  { %v408_v4 = vmul.f32 %v3247_v47, %v3239_v42  ;;  %v725_v11 = vpop.permute.xlu1 %724 }
 0x51a   :  { %v730_v12 = vsel %vm161_vm2, %v725_v11, 0 }
 0x51b   :  { %v412_v5 = vpack.c.bf16 %v408_v4, %v408_v4 }
 0x51c   :  { %v3249_v6 = vpop.eup %3248 }
 0x51d   :  { %v409_v7 = vmul.f32 %v3249_v6, %v3241_v44  ;;  %2948 = vmatmul.mubr.msk.bf16.vlgmr.msra.gmra.mrb[8].mxu0 %vm161_vm2, %v412_v5 }
 0x51e   :  { %2958 = vmatpush3.bf16.msra.mxu0 %v566_v48  ;;  %2959 = vmatprep.mubr.msk.bf16.mxu0 %vm3325_vm1, %v3324_v15 }
 0x51f   :  { %v413_v9 = vpack.c.bf16 %v409_v7, %v409_v7  ;;  %2969 = vmatprep.subr.bf16.mxu0 %v3324_v15 }
 0x521   :  { %2954 = vmatmul.mubr.msk.bf16.vlgmr.msra.gmra.mrb[16].mxu1 %vm161_vm2, %v413_v9 }
 0x522   :  { %2964 = vmatpush3.bf16.xpose.msra.mxu1 %v632_v10  ;;  %2965 = vmatprep.mubr.msk.bf16.mxu1 %vm3325_vm1, %v3324_v15 }
 0x523   :  { %2975 = vmatprep.subr.bf16.mxu1 %v3324_v15 }
 0x529   :  { %2966 = vmatmul.mubr.msk.bf16.vlgmr.msra.gmra.mrb[20].mxu1 %vm161_vm2, %v3505_v50 }
 0x52a   :  { %2976 = vmatpush3.bf16.xpose.msra.mxu1 %v730_v12  ;;  %2977 = vmatprep.mubr.msk.bf16.mxu1 %vm3325_vm1, %v3324_v15 }
 0x52b   :  { %2987 = vmatprep.subr.bf16.mxu1 %v3324_v15 }
 0x531   :  { %2978 = vmatmul.mubr.msk.bf16.vlgmr.msra.gmra.mrb[24].mxu1 %vm161_vm2, %v3512_v51 }
 0x532   :  { %2989 = vmatprep.mubr.msk.bf16.mxu1 %vm3325_vm1, %v3324_v15 }
 0x542   :  { %v402_v13 = vpop.xlane.xlu0 %401 }
 0x543   :  { %3250 = vrcp.f32 %v402_v13 }
 0x546   :  { %v676_v17 = vpop.permute.xlu0 %675 }
 0x547   :  { %v681_v19 = vsel %vm161_vm2, %v676_v17, 0 }
 0x54a   :  { %v774_v20 = vpop.permute.xlu0 %773 }
 0x54b   :  { %v779_v21 = vsel %vm161_vm2, %v774_v20, 0 }
 0x54d   :  { %v3251_v14 = vpop.eup %3250 }
 0x54e   :  { %v410_v16 = vmul.f32 %v3251_v14, %v3245_v59 }
 0x550   :  { %v414_v18 = vpack.c.bf16 %v410_v16, %v410_v16 }
 0x552   :  { %2960 = vmatmul.mubr.msk.bf16.vlgmr.msra.gmra.mrb[12].mxu0 %vm161_vm2, %v414_v18 }
 0x553   :  { %2970 = vmatpush3.bf16.xpose.msra.mxu0 %v681_v19  ;;  %2971 = vmatprep.mubr.msk.bf16.mxu0 %vm3325_vm1, %v3324_v15 }
 0x554   :  { %2981 = vmatprep.subr.bf16.mxu0 %v3324_v15 }
 0x55a   :  { %2972 = vmatmul.mubr.msk.bf16.vlgmr.msra.gmra.mrb[16].mxu0 %vm161_vm2, %v3523_v61 }
 0x55b   :  { %2982 = vmatpush3.bf16.xpose.msra.mxu0 %v779_v21  ;;  %2983 = vmatprep.mubr.msk.bf16.mxu0 %vm3325_vm1, %v3324_v15 }
 0x55c   :  { %2993 = vmatprep.subr.bf16.mxu0 %v3324_v15 }
 0x562   :  { %2984 = vmatmul.mubr.msk.bf16.vlgmr.msra.gmra.mrb[20].mxu0 %vm161_vm2, %v3528_v62 }
 0x563   :  { %2995 = vmatprep.mubr.msk.bf16.mxu0 %vm3325_vm1, %v3324_v15 }
 0x585   :  { %v3569_v22 = vpop.f32.mrb[12].mxu1 }
 0x586   :  { %v2943_v23 = vpop.f32.mrb[13].mxu1 }
 0x587   :  { %v461_v24 = vpop.f32.mrb[14].mxu1 }
 0x588   :  { %v2944_v25 = vpop.f32.mrb[15].mxu1 }
 0x5f0   :  { %v3571_v26 = vpop.f32.mrb[8].mxu0 }
 0x5f1   :  { %v2949_v27 = vpop.f32.mrb[9].mxu0 }
 0x5f2   :  { %v509_v28 = vpop.f32.mrb[10].mxu0 }
 0x5f3   :  { %v2950_v29 = vpop.f32.mrb[11].mxu0 }
 0x5f4   :  { %v3573_v30 = vpop.f32.mrb[16].mxu1 }
 0x5f5   :  { %v2955_v33 = vpop.f32.mrb[17].mxu1 }
 0x5f6   :  { %v557_v34 = vpop.f32.mrb[18].mxu1 }
 0x5f7   :  { %v2956_v39 = vpop.f32.mrb[19].mxu1 }
 0x5fc   :  { %v668_v40 = vpop.f32.mrb[20].mxu1 }
 0x5fd   :  { %v821_v42 = vmul.f32 0.35355338, %v668_v40  ;;  %v2967_v43 = vpop.f32.mrb[21].mxu1 }
 0x5fe   :  { %v671_v44 = vpop.f32.mrb[22].mxu1 }
 0x5ff   :  { %v2968_v49 = vpop.f32.mrb[23].mxu1  ;;  %v833_v52 = vadd.f32 %v2744_v41, %v821_v42 }
 0x601   :  { %v837_v53 = vsel %vm161_vm2, %v833_v52, -inf }
 0x602   :  { %838 = vmax.xlane.f32.xlu1 %v837_v53 }
 0x604   :  { %v766_v54 = vpop.f32.mrb[24].mxu1 }
 0x605   :  { %v2979_v55 = vpop.f32.mrb[25].mxu1  ;;  %v823_v63 = vmul.f32 0.35355338, %v766_v54 }
 0x606   :  { %v769_v45 = vpop.f32.mrb[26].mxu1 }
 0x607   :  { %v2980_v56 = vpop.f32.mrb[27].mxu1  ;;  %v835_v5 = vadd.f32 %v2744_v41, %v823_v63 }
 0x613   :  { %885 = vrot.lane.b32.xlu1 %v3505_v50, %s3330_s27  ;;  %v843_v50 = vsel %vm161_vm2, %v835_v5, -inf }
 0x625   :  { %v3581_v57 = vpop.f32.mrb[12].mxu0 }
 0x626   :  { %v2961_v58 = vpop.f32.mrb[13].mxu0 }
 0x627   :  { %v605_v59 = vpop.f32.mrb[14].mxu0 }
 0x628   :  { %v2962_v60 = vpop.f32.mrb[15].mxu0 }
 0x62d   :  { %v717_v46 = vpop.f32.mrb[16].mxu0 }
 0x62e   :  { %v822_v0 = vmul.f32 0.35355338, %v717_v46  ;;  %v2973_v1 = vpop.f32.mrb[17].mxu0 }
 0x62f   :  { %v720_v2 = vpop.f32.mrb[18].mxu0 }
 0x630   :  { %v2974_v3 = vpop.f32.mrb[19].mxu0  ;;  %v834_v47 = vadd.f32 %v2744_v41, %v822_v0 }
 0x632   :  { %v840_v4 = vsel %vm161_vm2, %v834_v47, -inf }
 0x633   :  { %841 = vmax.xlane.f32.xlu0 %v840_v4 }
 0x635   :  { %v815_v6 = vpop.f32.mrb[20].mxu0 }
 0x636   :  { %v824_v48 = vmul.f32 0.35355338, %v815_v6  ;;  %v2985_v7 = vpop.f32.mrb[21].mxu0 }
 0x637   :  { %v818_v8 = vpop.f32.mrb[22].mxu0  ;;  %844 = vmax.xlane.f32.xlu0 %v843_v50  ;;  %v3214_v50 = vld [vmem:[%s4016_s4] sm:$0xff]  }
 0x638   :  { %v2986_v9 = vpop.f32.mrb[23].mxu0  ;;  %v836_v10 = vadd.f32 %v2744_v41, %v824_v48  ;;  %v3215_v8 = vld [vmem:[%s4016_s4 + $0x8] sm:$0xff]  }
 0x63a   :  { %v846_v11 = vsel %vm161_vm2, %v836_v10, -inf }
 0x63b   :  { %847 = vmax.xlane.f32.xlu0 %v846_v11 }
 0x68f   :  { %v839_v12 = vpop.xlane.xlu1 %838 }
 0x690   :  { %v849_v13 = vsub.f32 %v833_v52, %v839_v12 }
 0x692   :  { %v853_v14 = vmul.f32 1.442695, %v849_v13 }
 0x693   :  { %v886_v16 = vpop.permute.xlu1 %885 }
 0x694   :  { %3252 = vpow2.f32 %v853_v14  ;;  %v891_v17 = vsel %vm420_vm3, %v886_v16, 0 }
 0x695   :  { %2988 = vmatpush3.bf16.msra.mxu1 %v891_v17 }
 0x696   :  { %2999 = vmatprep.subr.bf16.mxu1 %v3324_v15 }
 0x69e   :  { %v3253_v18 = vpop.eup %3252 }
 0x69f   :  { %v861_v19 = vsel %vm161_vm2, %v3253_v18, 0.0 }
 0x6a0   :  { %862 = vadd.xlane.f32.xlu1 %v861_v19 }
 0x6c0   :  { %v842_v20 = vpop.xlane.xlu0 %841 }
 0x6c1   :  { %v850_v21 = vsub.f32 %v834_v47, %v842_v20 }
 0x6c3   :  { %v855_v23 = vmul.f32 1.442695, %v850_v21 }
 0x6c4   :  { %v845_v24 = vpop.xlane.xlu0 %844 }
 0x6c5   :  { %3254 = vpow2.f32 %v855_v23  ;;  %v851_v25 = vsub.f32 %v835_v5, %v845_v24 }
 0x6c7   :  { %v857_v27 = vmul.f32 1.442695, %v851_v25 }
 0x6c8   :  { %v848_v28 = vpop.xlane.xlu0 %847 }
 0x6c9   :  { %3256 = vpow2.f32 %v857_v27  ;;  %v852_v29 = vsub.f32 %v836_v10, %v848_v28 }
 0x6cb   :  { %v859_v33 = vmul.f32 1.442695, %v852_v29 }
 0x6cd   :  { %3258 = vpow2.f32 %v859_v33 }
 0x6cf   :  { %v3255_v34 = vpop.eup %3254 }
 0x6d0   :  { %v864_v39 = vsel %vm161_vm2, %v3255_v34, 0.0 }
 0x6d1   :  { %865 = vadd.xlane.f32.xlu0 %v864_v39 }
 0x6d3   :  { %v3257_v40 = vpop.eup %3256 }
 0x6d4   :  { %v867_v41 = vsel %vm161_vm2, %v3257_v40, 0.0 }
 0x6d5   :  { %868 = vadd.xlane.f32.xlu1 %v867_v41 }
 0x6d7   :  { %v3259_v42 = vpop.eup %3258 }
 0x6d8   :  { %v870_v43 = vsel %vm161_vm2, %v3259_v42, 0.0 }
 0x6d9   :  { %871 = vadd.xlane.f32.xlu0 %v870_v43 }
 0x6e6   :  { %981 = vrot.lane.b32.xlu1 %v3512_v51, %s3330_s27 }
 0x6ea   :  { %1029 = vrot.lane.b32.xlu1 %v3528_v62, %s3330_s27 }
 0x6ef   :  { %933 = vrot.lane.b32.xlu0 %v3523_v61, %s3330_s27 }
 0x72d   :  { %v863_v44 = vpop.xlane.xlu1 %862 }
 0x72e   :  { %3260 = vrcp.f32 %v863_v44 }
 0x738   :  { %v3261_v49 = vpop.eup %3260 }
 0x739   :  { %v877_v52 = vmul.f32 %v3261_v49, %v3253_v18 }
 0x73b   :  { %v881_v53 = vpack.c.bf16 %v877_v52, %v877_v52 }
 0x73d   :  { %2990 = vmatmul.mubr.msk.bf16.vlgmr.msra.gmra.mrb[28].mxu1 %vm161_vm2, %v881_v53 }
 0x73e   :  { %3001 = vmatprep.mubr.msk.bf16.mxu1 %vm3325_vm1, %v3324_v15 }
 0x75e   :  { %v866_v54 = vpop.xlane.xlu0 %865 }
 0x75f   :  { %3262 = vrcp.f32 %v866_v54 }
 0x762   :  { %v869_v55 = vpop.xlane.xlu1 %868 }
 0x763   :  { %3264 = vrcp.f32 %v869_v55 }
 0x766   :  { %v982_v51 = vpop.permute.xlu1 %981  ;;  %v872_v45 = vpop.xlane.xlu0 %871 }
 0x767   :  { %v987_v62 = vsel %vm420_vm3, %v982_v51, 0  ;;  %3266 = vrcp.f32 %v872_v45 }
 0x768   :  { %3000 = vmatpush3.bf16.msra.mxu1 %v987_v62 }
 0x769   :  { %v3263_v61 = vpop.eup %3262  ;;  %3011 = vmatprep.subr.bf16.mxu1 %v3324_v15 }
 0x76a   :  { %v878_v56 = vmul.f32 %v3263_v61, %v3255_v34  ;;  %v934_v58 = vpop.permute.xlu0 %933  ;;  %v1030_v60 = vpop.permute.xlu1 %1029 }
 0x76b   :  { %v939_v59 = vsel %vm420_vm3, %v934_v58, 0  ;;  %v1035_v1 = vsel %vm420_vm3, %v1030_v60, 0 }
 0x76c   :  { %2994 = vmatpush3.bf16.msra.mxu0 %v939_v59  ;;  %v882_v46 = vpack.c.bf16 %v878_v56, %v878_v56 }
 0x76d   :  { %v3265_v63 = vpop.eup %3264  ;;  %3005 = vmatprep.subr.bf16.mxu0 %v3324_v15 }
 0x76e   :  { %v879_v0 = vmul.f32 %v3265_v63, %v3257_v40 }
 0x76f   :  { %2996 = vmatmul.mubr.msk.bf16.vlgmr.msra.gmra.mrb[24].mxu0 %vm161_vm2, %v882_v46 }
 0x770   :  { %3006 = vmatpush3.bf16.msra.mxu0 %v1035_v1  ;;  %v883_v2 = vpack.c.bf16 %v879_v0, %v879_v0  ;;  %3007 = vmatprep.mubr.msk.bf16.mxu0 %vm3325_vm1, %v3324_v15 }
 0x771   :  { %v3267_v3 = vpop.eup %3266  ;;  %3019 = vmatprep.subr.bf16.mxu0 %v3324_v15 }
 0x772   :  { %v880_v47 = vmul.f32 %v3267_v3, %v3259_v42  ;;  %3002 = vmatmul.mubr.msk.bf16.vlgmr.msra.gmra.mrb[32].mxu1 %vm161_vm2, %v883_v2 }
 0x773   :  { %3015 = vmatprep.mubr.msk.bf16.mxu1 %vm3325_vm1, %v3324_v15  ;;  %3012 = vmatpush3.bf16.msra.mxu1 %v3214_v50 }
 0x774   :  { %v884_v4 = vpack.c.bf16 %v880_v47, %v880_v47  ;;  %3013 = vmatprep.subr.bf16.mxu1 %v3324_v15 }
 0x777   :  { %3008 = vmatmul.mubr.msk.bf16.vlgmr.msra.gmra.mrb[28].mxu0 %vm161_vm2, %v884_v4  ;;  %3014 = vmatpush3.bf16.msra.mxu1 %v3215_v8 }
 0x778   :  { %3023 = vmatprep.mubr.msk.bf16.mxu0 %vm3325_vm1, %v3324_v15  ;;  %3027 = vmatprep.subr.bf16.mxu1 %v3324_v15 }
 0x810   :  { %v927_v5 = vpop.f32.mrb[28].mxu1 }
 0x811   :  { %v2991_v6 = vpop.f32.mrb[29].mxu1 }
 0x812   :  { %v930_v48 = vpop.f32.mrb[30].mxu1  ;;  %v3217_v6 = vld [vmem:[%s4018_s5 + $0x8] sm:$0xff]  }
 0x813   :  { %v2992_v7 = vpop.f32.mrb[31].mxu1  ;;  %v3661_v48 = vsub.s32 1, %v3424_v35 }
 0x815   :  { %v1205_v7 = vrot.slane %v3432_v37, %v3661_v48  ;;  %v1193_v37 = vsub.s32 2, %v3424_v35 }
 0x842   :  { %v975_v9 = vpop.f32.mrb[24].mxu0 }
 0x843   :  { %v3182_v10 = vpack.i.bf16 %v975_v9, %v3571_v26  ;;  %v2997_v11 = vpop.f32.mrb[25].mxu0 }
 0x844   :  { %v978_v12 = vpop.f32.mrb[26].mxu0 }
 0x845   :  { %3183 = vrot.lane.b32.xlu1 %v3182_v10, %s3331_s0  ;;  %v2998_v13 = vpop.f32.mrb[27].mxu0  ;;  %v1023_v14 = vpop.f32.mrb[32].mxu1 }
 0x846   :  { %v3187_v16 = vpack.i.bf16 %v1023_v14, %v3573_v30  ;;  %v3003_v17 = vpop.f32.mrb[33].mxu1 }
 0x847   :  { %v1026_v18 = vpop.f32.mrb[34].mxu1 }
 0x848   :  { %3188 = vrot.lane.b32.xlu0 %v3187_v16, %s3332_s13  ;;  %v3004_v19 = vpop.f32.mrb[35].mxu1 }
 0x84a   :  { %v1071_v20 = vpop.f32.mrb[28].mxu0 }
 0x84b   :  { %v3192_v26 = vpack.i.bf16 %v1071_v20, %v3581_v57  ;;  %v3009_v21 = vpop.f32.mrb[29].mxu0 }
 0x84c   :  { %v1074_v23 = vpop.f32.mrb[30].mxu0 }
 0x84d   :  { %3193 = vrot.lane.b32.xlu1 %v3192_v26, %s3333_s14  ;;  %v3010_v24 = vpop.f32.mrb[31].mxu0 }
 0x84e   :  { %v3218_v24 = vld [vmem:[%s4019_s6] sm:$0xff]  }
 0x8b7   :  { %v3184_v25 = vpop.permute.xlu1 %3183 }
 0x8b8   :  { %v3186_v28 = vunpack.i.h.bf16 %v3184_v25  ;;  %v3185_v29 = vunpack.i.l.bf16 %v3184_v25  ;;  %v3219_v25 = vld [vmem:[%s4019_s6 + $0x8] sm:$0xff]  }
 0x8ba   :  { %v3189_v27 = vpop.permute.xlu0 %3188  ;;  %v620_v39 = vsel %vm161_vm2, %v3569_v22, %v3185_v29  ;;  %v1089_v57 = vsel %vm161_vm2, %v927_v5, %v3186_v28  ;;  %v3643_v22 = vld [vmem:[%s4017_s7] sm:$0x3f]  ;;  %v3221_v28 = vld [vmem:[%s4019_s6 + $0x18] sm:$0xff]  }
 0x8bb   :  { %v3191_v30 = vunpack.i.h.bf16 %v3189_v27  ;;  %v3190_v33 = vunpack.i.l.bf16 %v3189_v27  ;;  %v1100_v53 = vrot.slane %v3643_v22, %v3427_v36  ;;  %v1188_v14 = vrot.slane %v3643_v22, %v3661_v48  ;;  %v3220_v27 = vld [vmem:[%s4019_s6 + $0x10] sm:$0xff]  }
 0x8bc   :  { %v1194_v19 = vrot.slane %v3643_v22, %v1193_v37 }
 0x8bd   :  { %v1090_v42 = vsel %vm621_vm4, %v1089_v57, %v3191_v30  ;;  %v622_v43 = vsel %vm621_vm4, %v620_v39, %v3190_v33 }
 0x8bf   :  { %v3194_v34 = vpop.permute.xlu1 %3193 }
 0x8c0   :  { %v3196_v40 = vunpack.i.h.bf16 %v3194_v34  ;;  %v3195_v41 = vunpack.i.l.bf16 %v3194_v34 }
 0x8c2   :  { %v624_v44 = vsel %vm623_vm5, %v622_v43, %v3195_v41  ;;  %v1091_v49 = vsel %vm623_vm5, %v1090_v42, %v3196_v40 }
 0x8c3   :  { %v1092_v52 = vpack.c.bf16 %v1091_v49, %v624_v44 }
 0x8c5   :  { %3016 = vmatmul.mubr.msk.bf16.vlgmr.msra.gmra.mrb[36].mxu1 %vm38_vm0, %v1092_v52 }
 0x8c6   :  { %3035 = vmatprep.mubr.msk.bf16.mxu1 %vm3325_vm1, %v3324_v15  ;;  %3028 = vmatpush3.bf16.msra.mxu1 %v3218_v24 }
 0x8c7   :  { %3029 = vmatprep.subr.bf16.mxu1 %v3324_v15 }
 0x8ca   :  { %3030 = vmatpush3.bf16.msra.mxu1 %v3219_v25 }
 0x8cb   :  { %3031 = vmatprep.subr.bf16.mxu1 %v3324_v15 }
 0x8ce   :  { %3032 = vmatpush3.bf16.msra.mxu1 %v3220_v27 }
 0x8cf   :  { %3033 = vmatprep.subr.bf16.mxu1 %v3324_v15 }
 0x8d2   :  { %3034 = vmatpush3.bf16.msra.mxu1 %v3221_v28 }
 0x8d3   :  { %3053 = vmatprep.subr.bf16.mxu1 %v3324_v15 }
 0x998   :  { %v1150_v54 = vpop.f32.mrb[36].mxu1 }
 0x999   :  { %v1151_v55 = vadd.f32 %v1150_v54, %v1100_v53  ;;  %v3017_v51 = vpop.f32.mrb[37].mxu1 }
 0x99a   :  { %v1153_v45 = vpop.f32.mrb[38].mxu1 }
 0x99b   :  { %v1154_v62 = vadd.f32 %v1153_v45, %v1100_v53  ;;  %v3018_v61 = vpop.f32.mrb[39].mxu1  ;;  %v1157_v56 = vadd.f32 %v1151_v55, %v3415_v31 }
 0x99d   :  { %v1159_v58 = vsel %vm38_vm0, %v1157_v56, 0.0  ;;  %v1158_v59 = vadd.f32 %v1154_v62, %v3417_v32  ;;  %v3216_v32 = vld [vmem:[%s4018_s5] sm:$0xff]  }
 0x99e   :  { %1160 = vadd.xlane.f32.xlu0 %v1159_v58  ;;  %3020 = vmatpush3.bf16.msra.mxu0 %v3216_v32 }
 0x99f   :  { %v1162_v60 = vsel %vm38_vm0, %v1158_v59, 0.0  ;;  %3021 = vmatprep.subr.bf16.mxu0 %v3324_v15 }
 0x9a0   :  { %1163 = vadd.xlane.f32.xlu1 %v1162_v60 }
 0x9a2   :  { %3022 = vmatpush3.bf16.msra.mxu0 %v3217_v6 }
 0x9a3   :  { %3039 = vmatprep.subr.bf16.mxu0 %v3324_v15 }
 0x9b1   :  { %1220 = vrot.lane.b32.xlu1 %v1205_v7, %s3334_s20 }
 0xa2b   :  { %v1161_v46 = vpop.xlane.xlu0 %1160 }
 0xa2c   :  { %v1165_v63 = vmul.f32 0.03125, %v1161_v46 }
 0xa2d   :  { %v1164_v0 = vpop.xlane.xlu1 %1163 }
 0xa2e   :  { %v1167_v1 = vsub.f32 %v1157_v56, %v1165_v63  ;;  %v1166_v2 = vmul.f32 0.03125, %v1164_v0  ;;  %v1289_v56 = vsub.s32 3, %v3424_v35 }
 0xa30   :  { %v1168_v3 = vsub.f32 %v1158_v59, %v1166_v2  ;;  %v1169_v47 = vmul.f32 %v1167_v1, %v1167_v1  ;;  %v1290_v58 = vrot.slane %v3643_v22, %v1289_v56 }
 0xa31   :  { %v1221_v30 = vpop.permute.xlu1 %1220 }
 0xa32   :  { %v1171_v4 = vsel %vm38_vm0, %v1169_v47, 0.0  ;;  %v1170_v5 = vmul.f32 %v1168_v3, %v1168_v3 }
 0xa33   :  { %1172 = vadd.xlane.f32.xlu0 %v1171_v4 }
 0xa34   :  { %v1174_v31 = vsel %vm38_vm0, %v1170_v5, 0.0 }
 0xa37   :  { %1175 = vadd.xlane.f32.xlu0 %v1174_v31 }
 0xa4d   :  { %1218 = vrot.lane.b32.xlu0 %v3436_v38, %s3334_s20 }
 0xac0   :  { %v1173_v50 = vpop.xlane.xlu0 %1172 }
 0xac1   :  { %v1177_v8 = vmul.f32 0.03125, %v1173_v50 }
 0xac3   :  { %v1179_v9 = vadd.f32 1e-12, %v1177_v8 }
 0xac4   :  { %v1176_v10 = vpop.xlane.xlu0 %1175 }
 0xac5   :  { %3268 = vrsqrt.f32 %v1179_v9  ;;  %v1178_v11 = vmul.f32 0.03125, %v1176_v10 }
 0xac7   :  { %v1180_v12 = vadd.f32 1e-12, %v1178_v11 }
 0xac8   :  { %v1219_v29 = vpop.permute.xlu0 %1218 }
 0xac9   :  { %3270 = vrsqrt.f32 %v1180_v12  ;;  %v1222_v33 = vsel %vm38_vm0, %v1219_v29, %v1221_v30  ;;  %v3222_v12 = vld [vmem:[%s4012_s3 + $0x10] sm:$0xff]  }
 0xacf   :  { %v3269_v13 = vpop.eup %3268 }
 0xad0   :  { %v1183_v16 = vmul.f32 %v3269_v13, %v1167_v1  ;;  %v3223_v13 = vld [vmem:[%s4012_s3 + $0x18] sm:$0xff]  }
 0xad2   :  { %v1189_v18 = vmul.f32 %v1188_v14, %v1183_v16 }
 0xad3   :  { %v3271_v17 = vpop.eup %3270 }
 0xad4   :  { %v1184_v38 = vmul.f32 %v3271_v17, %v1168_v3  ;;  %v1195_v26 = vadd.f32 %v1194_v19, %v1189_v18 }
 0xad6   :  { %v1190_v20 = vmul.f32 %v1188_v14, %v1184_v38 }
 0xad8   :  { %v1196_v21 = vadd.f32 %v1194_v19, %v1190_v20  ;;  %v1390_v20 = vsub.s32 4, %v3424_v35 }
 0xada   :  { %v1197_v23 = vpack.c.bf16 %v1196_v21, %v1195_v26 }
 0xadc   :  { %3024 = vmatmul.mubr.msk.bf16.vlgmr.msra.gmra.mrb[32].mxu0 %vm38_vm0, %v1197_v23 }
 0xadd   :  { %3043 = vmatprep.mubr.msk.bf16.mxu0 %vm3325_vm1, %v3324_v15  ;;  %3040 = vmatpush3.bf16.msra.mxu0 %v3222_v12 }
 0xade   :  { %3041 = vmatprep.subr.bf16.mxu0 %v3324_v15 }
 0xae1   :  { %3042 = vmatpush3.bf16.msra.mxu0 %v3223_v13 }
 0xae2   :  { %3047 = vmatprep.subr.bf16.mxu0 %v3324_v15 }
 0xbaf   :  { %v1261_v34 = vpop.f32.mrb[32].mxu0 }
 0xbb0   :  { %v1262_v39 = vadd.f32 %v1261_v34, %v1222_v33  ;;  %v3025_v57 = vpop.f32.mrb[33].mxu0 }
 0xbb1   :  { %v1264_v40 = vpop.f32.mrb[34].mxu0  ;;  %v3734_v57 = vld [vmem:[%s4014_s8 + $0x2] sm:$0x3] }
 0xbb2   :  { %v1270_v41 = vmul.f32 0.70710677, %v1262_v39  ;;  %v1265_v42 = vadd.f32 %v1264_v40, %v1222_v33  ;;  %v3026_v43 = vpop.f32.mrb[35].mxu0  ;;  %v1268_v54 = vmul.f32 0.5, %v1262_v39 }
 0xbb4   :  { %3272 = verf.f32 %v1270_v41  ;;  %v1271_v44 = vmul.f32 0.70710677, %v1265_v42  ;;  %v1269_v55 = vmul.f32 0.5, %v1265_v42 }
 0xbb6   :  { %3274 = verf.f32 %v1271_v44 }
 0xbbe   :  { %v3273_v49 = vpop.eup %3272 }
 0xbbf   :  { %v1274_v52 = vadd.f32 1.0, %v3273_v49 }
 0xbc0   :  { %v3275_v53 = vpop.eup %3274 }
 0xbc1   :  { %v1275_v51 = vadd.f32 1.0, %v3275_v53  ;;  %v1276_v45 = vmul.f32 %v1274_v52, %v1268_v54 }
 0xbc3   :  { %v1277_v62 = vmul.f32 %v1275_v51, %v1269_v55 }
 0xbc5   :  { %v1278_v61 = vpack.c.bf16 %v1277_v62, %v1276_v45 }
 0xbc7   :  { %3036 = vmatmul.mubr.msk.bf16.vlgmr.msra.gmra.mrb[40].mxu1 %vm1315_vm6, %v1278_v61 }
 0xbc8   :  { %3055 = vmatprep.mubr.msk.bf16.mxu1 %vm3325_vm1, %v3324_v15 }
 0xc9a   :  { %v1353_v59 = vpop.f32.mrb[40].mxu1 }
 0xc9b   :  { %v1354_v60 = vadd.f32 %v1353_v59, %v1290_v58  ;;  %v3037_v46 = vpop.f32.mrb[41].mxu1 }
 0xc9c   :  { %v1356_v63 = vpop.f32.mrb[42].mxu1 }
 0xc9d   :  { %v1357_v0 = vadd.f32 %v1356_v63, %v1290_v58  ;;  %v3038_v1 = vpop.f32.mrb[43].mxu1  ;;  %v1360_v2 = vadd.f32 %v1354_v60, %v1195_v26  ;;  %v1391_v26 = vrot.slane %v3643_v22, %v1390_v20 }
 0xc9f   :  { %v1362_v3 = vsel %vm38_vm0, %v1360_v2, 0.0  ;;  %v1361_v47 = vadd.f32 %v1357_v0, %v1196_v21  ;;  %v1396_v21 = vsub.s32 5, %v3424_v35  ;;  %v2773_v0 = vld [vmem:[%s4015_s1] ss:$0 sm:$0xff] }
 0xca0   :  { %1363 = vadd.xlane.f32.xlu1 %v1362_v3 }
 0xca1   :  { %v1365_v4 = vsel %vm38_vm0, %v1361_v47, 0.0  ;;  %v1397_v29 = vrot.slane %v3643_v22, %v1396_v21  ;;  %v3738_v22 = vrot.slane %v3734_v57, %v3427_v36 }
 0xca2   :  { %1366 = vadd.xlane.f32.xlu0 %v1365_v4 }
 0xd2d   :  { %v1364_v5 = vpop.xlane.xlu1 %1363 }
 0xd2e   :  { %v1368_v31 = vmul.f32 0.03125, %v1364_v5 }
 0xd2f   :  { %v1367_v32 = vpop.xlane.xlu0 %1366 }
 0xd30   :  { %v1370_v6 = vsub.f32 %v1360_v2, %v1368_v31  ;;  %v1369_v7 = vmul.f32 0.03125, %v1367_v32 }
 0xd32   :  { %v1371_v50 = vsub.f32 %v1361_v47, %v1369_v7  ;;  %v1372_v8 = vmul.f32 %v1370_v6, %v1370_v6 }
 0xd34   :  { %v1374_v9 = vsel %vm38_vm0, %v1372_v8, 0.0  ;;  %v1373_v10 = vmul.f32 %v1371_v50, %v1371_v50 }
 0xd35   :  { %1375 = vadd.xlane.f32.xlu0 %v1374_v9 }
 0xd36   :  { %v1377_v11 = vsel %vm38_vm0, %v1373_v10, 0.0 }
 0xd37   :  { %1378 = vadd.xlane.f32.xlu1 %v1377_v11 }
 0xdc2   :  { %v1376_v14 = vpop.xlane.xlu0 %1375 }
 0xdc3   :  { %v1380_v16 = vmul.f32 0.03125, %v1376_v14 }
 0xdc4   :  { %v1379_v17 = vpop.xlane.xlu1 %1378 }
 0xdc5   :  { %v1382_v18 = vadd.f32 1e-12, %v1380_v16  ;;  %v1381_v38 = vmul.f32 0.03125, %v1379_v17 }
 0xdc7   :  { %3276 = vrsqrt.f32 %v1382_v18  ;;  %v1383_v19 = vadd.f32 1e-12, %v1381_v38 }
 0xdc9   :  { %3278 = vrsqrt.f32 %v1383_v19 }
 0xdd1   :  { %v3277_v23 = vpop.eup %3276 }
 0xdd2   :  { %v1386_v24 = vmul.f32 %v3277_v23, %v1370_v6 }
 0xdd3   :  { %v3279_v25 = vpop.eup %3278 }
 0xdd4   :  { %v1392_v27 = vmul.f32 %v1391_v26, %v1386_v24  ;;  %v1387_v28 = vmul.f32 %v3279_v25, %v1371_v50 }
 0xdd6   :  { %v1393_v30 = vmul.f32 %v1391_v26, %v1387_v28  ;;  %v3722_v33 = vadd.f32 %v1397_v29, %v1392_v27 }
 0xdd8   :  { %v3724_v34 = vadd.f32 %v1397_v29, %v1393_v30 }
 0xdda   :  { %v1404_v39 = vpack.c.bf16 %v3724_v34, %v3722_v33 }
 0xddc   :  { %3044 = vmatmul.mubr.msk.bf16.vlgmr.msra.gmra.mrb[36].mxu0 %vm38_vm0, %v1404_v39 }
 0xddd   :  { %3049 = vmatprep.mubr.msk.bf16.mxu0 %vm3325_vm1, %v3324_v15 }
 0xeaf   :  { %v1465_v40 = vpop.f32.mrb[36].mxu0 }
 0xeb0   :  { %v3045_v41 = vpop.f32.mrb[37].mxu0  ;;  %v1466_v43 = vadd.f32 %v1465_v40, %v3738_v22 }
 0xeb1   :  { %v1468_v42 = vpop.f32.mrb[38].mxu0 }
 0xeb2   :  { %v1469_v44 = vadd.f32 %v1468_v42, %v3738_v22  ;;  %v3046_v49 = vpop.f32.mrb[39].mxu0 }
 0xeb4   :  { %v3742_v52 = vpack.c.bf16 %v1469_v44, %v1466_v43 }
 0xeb6   :  { %1476 = vrot.lane.b32.xlu1 %v3742_v52, %s3326_s21  ;;  %1474 = vrot.lane.b32.xlu0 %v3742_v52, %s3327_s22 }
 0xeba   :  { %1478 = vrot.lane.b32.xlu1 %v3742_v52, %s3328_s23 }
 0xebe   :  { %1480 = vrot.lane.b32.xlu1 %v3742_v52, %s3329_s24 }
 0xf28   :  { %v3752_v53 = vpop.permute.xlu1 %1476  ;;  %v3754_v54 = vpop.permute.xlu0 %1474 }
 0xf29   :  { %1576 = vrot.lane.b32.xlu1 %v3752_v53, %s3329_s24  ;;  %1528 = vrot.lane.b32.xlu0 %v3754_v54, %s3329_s24 }
 0xf2c   :  { %v3760_v55 = vpop.permute.xlu1 %1478 }
 0xf2d   :  { %1624 = vrot.lane.b32.xlu0 %v3760_v55, %s3329_s24 }
 0xf30   :  { %v1481_v51 = vpop.permute.xlu1 %1480 }
 0xf31   :  { %v1486_v45 = vsel %vm161_vm2, %v1481_v51, 0 }
 0xf32   :  { %3048 = vmatpush3.bf16.xpose.msra.mxu0 %v1486_v45 }
 0xf33   :  { %3059 = vmatprep.subr.bf16.mxu0 %v3324_v15 }
 0xf39   :  { %3050 = vmatmul.mubr.msk.bf16.vlgmr.msra.gmra.mrb[40].mxu0 %vm161_vm2, %v3742_v52 }
 0xf3a   :  { %3061 = vmatprep.mubr.msk.bf16.mxu0 %vm3325_vm1, %v3324_v15 }
 0xf9b   :  { %v1577_v62 = vpop.permute.xlu1 %1576  ;;  %v1529_v61 = vpop.permute.xlu0 %1528 }
 0xf9c   :  { %v1582_v58 = vsel %vm161_vm2, %v1577_v62, 0  ;;  %v1534_v59 = vsel %vm161_vm2, %v1529_v61, 0 }
 0xf9d   :  { %3054 = vmatpush3.bf16.xpose.msra.mxu1 %v1534_v59  ;;  %3060 = vmatpush3.bf16.xpose.msra.mxu0 %v1582_v58 }
 0xf9e   :  { %3065 = vmatprep.subr.bf16.mxu1 %v3324_v15  ;;  %3071 = vmatprep.subr.bf16.mxu0 %v3324_v15 }
 0xf9f   :  { %v1625_v60 = vpop.permute.xlu0 %1624 }
 0xfa0   :  { %v1630_v46 = vsel %vm161_vm2, %v1625_v60, 0  ;;  %v3807_v60 = vrot.slane %v3742_v52, 4 }
 0xfa4   :  { %3056 = vmatmul.mubr.msk.bf16.vlgmr.msra.gmra.mrb[44].mxu1 %vm161_vm2, %v3754_v54  ;;  %3062 = vmatmul.mubr.msk.bf16.vlgmr.msra.gmra.mrb[44].mxu0 %vm161_vm2, %v3752_v53 }
 0xfa5   :  { %3066 = vmatpush3.bf16.xpose.msra.mxu1 %v1630_v46  ;;  %3067 = vmatprep.mubr.msk.bf16.mxu1 %vm3325_vm1, %v3324_v15  ;;  %v3814_v46 = vrot.slane %v3752_v53, 4 }
 0xfa6   :  { %3073 = vmatprep.mubr.msk.bf16.mxu0 %vm3325_vm1, %v3324_v15  ;;  %3077 = vmatprep.subr.bf16.mxu1 %v3324_v15 }
 0xfac   :  { %3068 = vmatmul.mubr.msk.bf16.vlgmr.msra.gmra.mrb[48].mxu1 %vm161_vm2, %v3760_v55 }
 0xfad   :  { %3079 = vmatprep.mubr.msk.bf16.mxu1 %vm3325_vm1, %v3324_v15 }
0x100c   :  { %v1522_v63 = vpop.f32.mrb[40].mxu0 }
0x100d   :  { %v1672_v1 = vmul.f32 0.35355338, %v1522_v63  ;;  %v3051_v2 = vpop.f32.mrb[41].mxu0 }
0x100e   :  { %v1525_v3 = vpop.f32.mrb[42].mxu0 }
0x100f   :  { %v3052_v47 = vpop.f32.mrb[43].mxu0  ;;  %v1683_v4 = vadd.f32 %v2773_v0, %v1672_v1 }
0x1011   :  { %v1687_v5 = vsel %vm161_vm2, %v1683_v4, -inf }
0x1012   :  { %1688 = vmax.xlane.f32.xlu1 %v1687_v5 }
0x1023   :  { %1735 = vrot.lane.b32.xlu1 %v3742_v52, %s3330_s27 }
0x1077   :  { %v1570_v31 = vpop.f32.mrb[44].mxu1  ;;  %v1618_v32 = vpop.f32.mrb[44].mxu0 }
0x1078   :  { %v1673_v6 = vmul.f32 0.35355338, %v1570_v31  ;;  %v1674_v7 = vmul.f32 0.35355338, %v1618_v32  ;;  %v3057_v50 = vpop.f32.mrb[45].mxu1  ;;  %v3063_v8 = vpop.f32.mrb[45].mxu0 }
0x1079   :  { %v1573_v9 = vpop.f32.mrb[46].mxu1  ;;  %v1621_v10 = vpop.f32.mrb[46].mxu0  ;;  %v3825_v32 = vrot.slane %v3754_v54, 4 }
0x107a   :  { %v3058_v11 = vpop.f32.mrb[47].mxu1  ;;  %v3064_v12 = vpop.f32.mrb[47].mxu0  ;;  %v1684_v13 = vadd.f32 %v2773_v0, %v1673_v6  ;;  %v1685_v16 = vadd.f32 %v2773_v0, %v1674_v7  ;;  %v3830_v6 = vrot.slane %v3760_v55, 4 }
0x107c   :  { %v1690_v14 = vsel %vm161_vm2, %v1684_v13, -inf  ;;  %v1693_v19 = vsel %vm161_vm2, %v1685_v16, -inf }
0x107d   :  { %1691 = vmax.xlane.f32.xlu0 %v1690_v14 }
0x107f   :  { %v1666_v17 = vpop.f32.mrb[48].mxu1 }
0x1080   :  { %v1675_v18 = vmul.f32 0.35355338, %v1666_v17  ;;  %v3069_v38 = vpop.f32.mrb[49].mxu1 }
0x1081   :  { %1694 = vmax.xlane.f32.xlu0 %v1693_v19  ;;  %v1669_v26 = vpop.f32.mrb[50].mxu1 }
0x1082   :  { %v3070_v23 = vpop.f32.mrb[51].mxu1  ;;  %v1686_v24 = vadd.f32 %v2773_v0, %v1675_v18 }
0x1084   :  { %v1696_v25 = vsel %vm161_vm2, %v1686_v24, -inf }
0x1085   :  { %1697 = vmax.xlane.f32.xlu0 %v1696_v25 }
0x109f   :  { %v1689_v27 = vpop.xlane.xlu1 %1688 }
0x10a0   :  { %v1699_v28 = vsub.f32 %v1683_v4, %v1689_v27 }
0x10a2   :  { %v1703_v29 = vmul.f32 1.442695, %v1699_v28 }
0x10a3   :  { %v1736_v30 = vpop.permute.xlu1 %1735 }
0x10a4   :  { %3280 = vpow2.f32 %v1703_v29  ;;  %v1741_v39 = vsel %vm420_vm3, %v1736_v30, 0 }
0x10a5   :  { %3072 = vmatpush3.bf16.msra.mxu0 %v1741_v39 }
0x10a6   :  { %3083 = vmatprep.subr.bf16.mxu0 %v3324_v15 }
0x10ae   :  { %v3281_v40 = vpop.eup %3280 }
0x10af   :  { %v1711_v41 = vsel %vm161_vm2, %v3281_v40, 0.0 }
0x10b0   :  { %1712 = vadd.xlane.f32.xlu1 %v1711_v41 }
0x10c1   :  { %1831 = vrot.lane.b32.xlu1 %v3752_v53, %s3330_s27 }
0x10c5   :  { %1879 = vrot.lane.b32.xlu1 %v3760_v55, %s3330_s27 }
0x110a   :  { %v1692_v42 = vpop.xlane.xlu0 %1691 }
0x110b   :  { %v1700_v43 = vsub.f32 %v1684_v13, %v1692_v42 }
0x110d   :  { %v1705_v44 = vmul.f32 1.442695, %v1700_v43 }
0x110e   :  { %v1695_v49 = vpop.xlane.xlu0 %1694 }
0x110f   :  { %3282 = vpow2.f32 %v1705_v44  ;;  %v1701_v51 = vsub.f32 %v1685_v16, %v1695_v49 }
0x1111   :  { %v1707_v45 = vmul.f32 1.442695, %v1701_v51 }
0x1112   :  { %v1698_v63 = vpop.xlane.xlu0 %1697 }
0x1113   :  { %3284 = vpow2.f32 %v1707_v45  ;;  %v1702_v0 = vsub.f32 %v1686_v24, %v1698_v63  ;;  %v2783_v63 = vld [vmem:[%s4015_s1 + $0x1] ss:$0 sm:$0xff] }
0x1115   :  { %v1709_v2 = vmul.f32 1.442695, %v1702_v0 }
0x1119   :  { %v3283_v62 = vpop.eup %3282 }
0x111a   :  { %v1714_v61 = vsel %vm161_vm2, %v3283_v62, 0.0 }
0x111b   :  { %1715 = vadd.xlane.f32.xlu0 %v1714_v61 }
0x111d   :  { %v3285_v58 = vpop.eup %3284 }
0x111e   :  { %v1717_v59 = vsel %vm161_vm2, %v3285_v58, 0.0 }
0x111f   :  { %1718 = vadd.xlane.f32.xlu1 %v1717_v59 }
0x1130   :  { %1943 = vrot.lane.b32.xlu1 %v3807_v60, %s3329_s24 }
0x1131   :  { %1783 = vrot.lane.b32.xlu0 %v3754_v54, %s3330_s27 }
0x1134   :  { %2041 = vrot.lane.b32.xlu1 %v3814_v46, %s3329_s24 }
0x113d   :  { %v1713_v1 = vpop.xlane.xlu1 %1712 }
0x113e   :  { %3286 = vrcp.f32 %v1713_v1 }
0x113f   :  { %3288 = vpow2.f32 %v1709_v2 }
0x1141   :  { %v1832_v47 = vpop.permute.xlu1 %1831 }
0x1142   :  { %v1837_v31 = vsel %vm420_vm3, %v1832_v47, 0 }
0x1145   :  { %v1880_v7 = vpop.permute.xlu1 %1879 }
0x1146   :  { %v1885_v55 = vsel %vm420_vm3, %v1880_v7, 0 }
0x1148   :  { %v3287_v52 = vpop.eup %3286 }
0x1149   :  { %v1727_v3 = vmul.f32 %v3287_v52, %v3281_v40  ;;  %v3289_v5 = vpop.eup %3288 }
0x114a   :  { %v1720_v53 = vsel %vm161_vm2, %v3289_v5, 0.0 }
0x114b   :  { %v1731_v4 = vpack.c.bf16 %v1727_v3, %v1727_v3 }
0x114d   :  { %3074 = vmatmul.mubr.msk.bf16.vlgmr.msra.gmra.mrb[48].mxu0 %vm161_vm2, %v1731_v4 }
0x114e   :  { %3084 = vmatpush3.bf16.msra.mxu0 %v1837_v31  ;;  %3085 = vmatprep.mubr.msk.bf16.mxu0 %vm3325_vm1, %v3324_v15 }
0x114f   :  { %3095 = vmatprep.subr.bf16.mxu0 %v3324_v15 }
0x1150   :  { %1721 = vadd.xlane.f32.xlu0 %v1720_v53 }
0x1166   :  { %1992 = vrot.lane.b32.xlu0 %v3825_v32, %s3329_s24 }
0x116a   :  { %2090 = vrot.lane.b32.xlu0 %v3830_v6, %s3329_s24 }
0x11a8   :  { %v1716_v50 = vpop.xlane.xlu0 %1715 }
0x11a9   :  { %3290 = vrcp.f32 %v1716_v50 }
0x11ac   :  { %v1719_v8 = vpop.xlane.xlu1 %1718  ;;  %v1784_v9 = vpop.permute.xlu0 %1783 }
0x11ad   :  { %3292 = vrcp.f32 %v1719_v8  ;;  %v1789_v10 = vsel %vm420_vm3, %v1784_v9, 0 }
0x11ae   :  { %3078 = vmatpush3.bf16.msra.mxu1 %v1789_v10 }
0x11af   :  { %3089 = vmatprep.subr.bf16.mxu1 %v3324_v15 }
0x11b0   :  { %v1944_v16 = vpop.permute.xlu1 %1943 }
0x11b1   :  { %v1949_v18 = vsel %vm161_vm2, %v1944_v16, 0 }
0x11b3   :  { %v3291_v54 = vpop.eup %3290 }
0x11b4   :  { %v1728_v11 = vmul.f32 %v3291_v54, %v3283_v62  ;;  %v2042_v38 = vpop.permute.xlu1 %2041 }
0x11b5   :  { %v2047_v19 = vsel %vm161_vm2, %v2042_v38, 0 }
0x11b6   :  { %v1732_v12 = vpack.c.bf16 %v1728_v11, %v1728_v11 }
0x11b7   :  { %v3293_v13 = vpop.eup %3292 }
0x11b8   :  { %v1729_v14 = vmul.f32 %v3293_v13, %v3285_v58  ;;  %3080 = vmatmul.mubr.msk.bf16.vlgmr.msra.gmra.mrb[52].mxu1 %vm161_vm2, %v1732_v12 }
0x11b9   :  { %3090 = vmatpush3.bf16.msra.mxu1 %v1885_v55  ;;  %3091 = vmatprep.mubr.msk.bf16.mxu1 %vm3325_vm1, %v3324_v15 }
0x11ba   :  { %v1733_v17 = vpack.c.bf16 %v1729_v14, %v1729_v14  ;;  %3101 = vmatprep.subr.bf16.mxu1 %v3324_v15 }
0x11bc   :  { %3086 = vmatmul.mubr.msk.bf16.vlgmr.msra.gmra.mrb[52].mxu0 %vm161_vm2, %v1733_v17 }
0x11bd   :  { %3096 = vmatpush3.bf16.xpose.msra.mxu0 %v1949_v18  ;;  %3097 = vmatprep.mubr.msk.bf16.mxu0 %vm3325_vm1, %v3324_v15 }
0x11be   :  { %3107 = vmatprep.subr.bf16.mxu0 %v3324_v15 }
0x11c4   :  { %3098 = vmatmul.mubr.msk.bf16.vlgmr.msra.gmra.mrb[56].mxu0 %vm161_vm2, %v3807_v60 }
0x11c5   :  { %3108 = vmatpush3.bf16.xpose.msra.mxu0 %v2047_v19  ;;  %3109 = vmatprep.mubr.msk.bf16.mxu0 %vm3325_vm1, %v3324_v15 }
0x11c6   :  { %3119 = vmatprep.subr.bf16.mxu0 %v3324_v15 }
0x11cc   :  { %3110 = vmatmul.mubr.msk.bf16.vlgmr.msra.gmra.mrb[60].mxu0 %vm161_vm2, %v3814_v46 }
0x11cd   :  { %3121 = vmatprep.mubr.msk.bf16.mxu0 %vm3325_vm1, %v3324_v15 }
0x11dd   :  { %v1722_v26 = vpop.xlane.xlu0 %1721 }
0x11de   :  { %3294 = vrcp.f32 %v1722_v26 }
0x11e1   :  { %v1993_v25 = vpop.permute.xlu0 %1992 }
0x11e2   :  { %v1998_v28 = vsel %vm161_vm2, %v1993_v25, 0 }
0x11e5   :  { %v2091_v29 = vpop.permute.xlu0 %2090 }
0x11e6   :  { %v2096_v30 = vsel %vm161_vm2, %v2091_v29, 0 }
0x11e8   :  { %v3295_v23 = vpop.eup %3294 }
0x11e9   :  { %v1730_v24 = vmul.f32 %v3295_v23, %v3289_v5 }
0x11eb   :  { %v1734_v27 = vpack.c.bf16 %v1730_v24, %v1730_v24 }
0x11ed   :  { %3092 = vmatmul.mubr.msk.bf16.vlgmr.msra.gmra.mrb[56].mxu1 %vm161_vm2, %v1734_v27 }
0x11ee   :  { %3102 = vmatpush3.bf16.xpose.msra.mxu1 %v1998_v28  ;;  %3103 = vmatprep.mubr.msk.bf16.mxu1 %vm3325_vm1, %v3324_v15 }
0x11ef   :  { %3113 = vmatprep.subr.bf16.mxu1 %v3324_v15 }
0x11f5   :  { %3104 = vmatmul.mubr.msk.bf16.vlgmr.msra.gmra.mrb[60].mxu1 %vm161_vm2, %v3825_v32 }
0x11f6   :  { %3114 = vmatpush3.bf16.xpose.msra.mxu1 %v2096_v30  ;;  %3115 = vmatprep.mubr.msk.bf16.mxu1 %vm3325_vm1, %v3324_v15 }
0x11f7   :  { %3125 = vmatprep.subr.bf16.mxu1 %v3324_v15 }
0x11fd   :  { %3116 = vmatmul.mubr.msk.bf16.vlgmr.msra.gmra.mrb[64].mxu1 %vm161_vm2, %v3830_v6 }
0x11fe   :  { %3127 = vmatprep.mubr.msk.bf16.mxu1 %vm3325_vm1, %v3324_v15 }
0x1220   :  { %v3871_v39 = vpop.f32.mrb[48].mxu0 }
0x1221   :  { %v3075_v40 = vpop.f32.mrb[49].mxu0 }
0x1222   :  { %v1780_v41 = vpop.f32.mrb[50].mxu0 }
0x1223   :  { %v3076_v42 = vpop.f32.mrb[51].mxu0 }
0x128b   :  { %v3873_v43 = vpop.f32.mrb[52].mxu1 }
0x128c   :  { %v3081_v44 = vpop.f32.mrb[53].mxu1 }
0x128d   :  { %v1828_v49 = vpop.f32.mrb[54].mxu1 }
0x128e   :  { %v3082_v51 = vpop.f32.mrb[55].mxu1 }
0x128f   :  { %v3875_v45 = vpop.f32.mrb[52].mxu0 }
0x1290   :  { %v3087_v62 = vpop.f32.mrb[53].mxu0 }
0x1291   :  { %v1876_v61 = vpop.f32.mrb[54].mxu0 }
0x1292   :  { %v3088_v58 = vpop.f32.mrb[55].mxu0 }
0x1297   :  { %v1985_v59 = vpop.f32.mrb[56].mxu0 }
0x1298   :  { %v2138_v0 = vmul.f32 0.35355338, %v1985_v59  ;;  %v3099_v1 = vpop.f32.mrb[57].mxu0 }
0x1299   :  { %v1988_v2 = vpop.f32.mrb[58].mxu0 }
0x129a   :  { %v3100_v52 = vpop.f32.mrb[59].mxu0  ;;  %v2149_v3 = vadd.f32 %v2783_v63, %v2138_v0 }
0x129c   :  { %v2153_v47 = vsel %vm161_vm2, %v2149_v3, -inf }
0x129d   :  { %2154 = vmax.xlane.f32.xlu1 %v2153_v47 }
0x129f   :  { %v2083_v4 = vpop.f32.mrb[60].mxu0 }
0x12a0   :  { %v3111_v5 = vpop.f32.mrb[61].mxu0  ;;  %v2140_v54 = vmul.f32 0.35355338, %v2083_v4 }
0x12a1   :  { %v2086_v31 = vpop.f32.mrb[62].mxu0 }
0x12a2   :  { %v3112_v53 = vpop.f32.mrb[63].mxu0  ;;  %v2151_v17 = vadd.f32 %v2783_v63, %v2140_v54 }
0x12ae   :  { %2201 = vrot.lane.b32.xlu1 %v3807_v60, %s3330_s27  ;;  %v2159_v60 = vsel %vm161_vm2, %v2151_v17, -inf }
0x12c0   :  { %v3883_v7 = vpop.f32.mrb[56].mxu1 }
0x12c1   :  { %v3093_v50 = vpop.f32.mrb[57].mxu1 }
0x12c2   :  { %v1924_v8 = vpop.f32.mrb[58].mxu1 }
0x12c3   :  { %v3094_v9 = vpop.f32.mrb[59].mxu1 }
0x12c8   :  { %v2034_v10 = vpop.f32.mrb[60].mxu1 }
0x12c9   :  { %v2139_v11 = vmul.f32 0.35355338, %v2034_v10  ;;  %v3105_v12 = vpop.f32.mrb[61].mxu1 }
0x12ca   :  { %v2037_v13 = vpop.f32.mrb[62].mxu1 }
0x12cb   :  { %v3106_v55 = vpop.f32.mrb[63].mxu1  ;;  %v2150_v14 = vadd.f32 %v2783_v63, %v2139_v11 }
0x12cd   :  { %v2156_v16 = vsel %vm161_vm2, %v2150_v14, -inf }
0x12ce   :  { %2157 = vmax.xlane.f32.xlu0 %v2156_v16 }
0x12d0   :  { %v2132_v18 = vpop.f32.mrb[64].mxu1 }
0x12d1   :  { %v2141_v38 = vmul.f32 0.35355338, %v2132_v18  ;;  %v3117_v19 = vpop.f32.mrb[65].mxu1 }
0x12d2   :  { %2160 = vmax.xlane.f32.xlu0 %v2159_v60  ;;  %v2135_v26 = vpop.f32.mrb[66].mxu1 }
0x12d3   :  { %v3118_v23 = vpop.f32.mrb[67].mxu1  ;;  %v2152_v24 = vadd.f32 %v2783_v63, %v2141_v38 }
0x12d5   :  { %v2162_v25 = vsel %vm161_vm2, %v2152_v24, -inf }
0x12d6   :  { %2163 = vmax.xlane.f32.xlu0 %v2162_v25 }
0x132a   :  { %v2155_v27 = vpop.xlane.xlu1 %2154 }
0x132b   :  { %v2165_v28 = vsub.f32 %v2149_v3, %v2155_v27  ;;  %v3224_v27 = vld [vmem:[%s4016_s4 + $0x10] sm:$0xff]  }
0x132d   :  { %v2169_v29 = vmul.f32 1.442695, %v2165_v28  ;;  %v3225_v28 = vld [vmem:[%s4016_s4 + $0x18] sm:$0xff]  }
0x132e   :  { %v2202_v30 = vpop.permute.xlu1 %2201 }
0x132f   :  { %3296 = vpow2.f32 %v2169_v29  ;;  %v2207_v40 = vsel %vm420_vm3, %v2202_v30, 0 }
0x1330   :  { %3120 = vmatpush3.bf16.msra.mxu0 %v2207_v40 }
0x1331   :  { %3131 = vmatprep.subr.bf16.mxu0 %v3324_v15 }
0x1339   :  { %v3297_v41 = vpop.eup %3296 }
0x133a   :  { %v2177_v42 = vsel %vm161_vm2, %v3297_v41, 0.0 }
0x133b   :  { %2178 = vadd.xlane.f32.xlu1 %v2177_v42 }
0x135b   :  { %v2158_v44 = vpop.xlane.xlu0 %2157 }
0x135c   :  { %v2166_v49 = vsub.f32 %v2150_v14, %v2158_v44 }
0x135e   :  { %v2171_v51 = vmul.f32 1.442695, %v2166_v49 }
0x135f   :  { %v2161_v62 = vpop.xlane.xlu0 %2160 }
0x1360   :  { %3298 = vpow2.f32 %v2171_v51  ;;  %v2167_v61 = vsub.f32 %v2151_v17, %v2161_v62 }
0x1362   :  { %v2173_v58 = vmul.f32 1.442695, %v2167_v61 }
0x1363   :  { %v2164_v59 = vpop.xlane.xlu0 %2163 }
0x1364   :  { %3300 = vpow2.f32 %v2173_v58  ;;  %v2168_v63 = vsub.f32 %v2152_v24, %v2164_v59 }
0x1366   :  { %v2175_v0 = vmul.f32 1.442695, %v2168_v63 }
0x1368   :  { %3302 = vpow2.f32 %v2175_v0 }
0x136a   :  { %v3299_v1 = vpop.eup %3298 }
0x136b   :  { %v2180_v2 = vsel %vm161_vm2, %v3299_v1, 0.0 }
0x136c   :  { %2181 = vadd.xlane.f32.xlu0 %v2180_v2 }
0x136e   :  { %v3301_v52 = vpop.eup %3300 }
0x136f   :  { %v2183_v3 = vsel %vm161_vm2, %v3301_v52, 0.0 }
0x1370   :  { %2184 = vadd.xlane.f32.xlu1 %v2183_v3 }
0x1372   :  { %v3303_v47 = vpop.eup %3302 }
0x1373   :  { %v2186_v4 = vsel %vm161_vm2, %v3303_v47, 0.0 }
0x1374   :  { %2187 = vadd.xlane.f32.xlu0 %v2186_v4 }
0x1381   :  { %2297 = vrot.lane.b32.xlu1 %v3814_v46, %s3330_s27 }
0x1385   :  { %2345 = vrot.lane.b32.xlu1 %v3830_v6, %s3330_s27 }
0x138a   :  { %2249 = vrot.lane.b32.xlu0 %v3825_v32, %s3330_s27 }
0x13c8   :  { %v2179_v5 = vpop.xlane.xlu1 %2178 }
0x13c9   :  { %3304 = vrcp.f32 %v2179_v5 }
0x13d3   :  { %v3305_v31 = vpop.eup %3304 }
0x13d4   :  { %v2193_v53 = vmul.f32 %v3305_v31, %v3297_v41 }
0x13d6   :  { %v2197_v50 = vpack.c.bf16 %v2193_v53, %v2193_v53 }
0x13d8   :  { %3122 = vmatmul.mubr.msk.bf16.vlgmr.msra.gmra.mrb[64].mxu0 %vm161_vm2, %v2197_v50 }
0x13d9   :  { %3133 = vmatprep.mubr.msk.bf16.mxu0 %vm3325_vm1, %v3324_v15 }
0x13f9   :  { %v2182_v8 = vpop.xlane.xlu0 %2181 }
0x13fa   :  { %3306 = vrcp.f32 %v2182_v8 }
0x13fd   :  { %v2185_v9 = vpop.xlane.xlu1 %2184 }
0x13fe   :  { %3308 = vrcp.f32 %v2185_v9 }
0x1401   :  { %v2298_v46 = vpop.permute.xlu1 %2297  ;;  %v2188_v10 = vpop.xlane.xlu0 %2187 }
0x1402   :  { %v2303_v6 = vsel %vm420_vm3, %v2298_v46, 0  ;;  %3310 = vrcp.f32 %v2188_v10 }
0x1403   :  { %3132 = vmatpush3.bf16.msra.mxu0 %v2303_v6 }
0x1404   :  { %v3307_v32 = vpop.eup %3306  ;;  %3143 = vmatprep.subr.bf16.mxu0 %v3324_v15 }
0x1405   :  { %v2194_v54 = vmul.f32 %v3307_v32, %v3299_v1  ;;  %v2250_v11 = vpop.permute.xlu0 %2249  ;;  %v2346_v13 = vpop.permute.xlu1 %2345 }
0x1406   :  { %v2255_v12 = vsel %vm420_vm3, %v2250_v11, 0  ;;  %v2351_v17 = vsel %vm420_vm3, %v2346_v13, 0 }
0x1407   :  { %3126 = vmatpush3.bf16.msra.mxu1 %v2255_v12  ;;  %v2198_v55 = vpack.c.bf16 %v2194_v54, %v2194_v54 }
0x1408   :  { %v3309_v14 = vpop.eup %3308  ;;  %3137 = vmatprep.subr.bf16.mxu1 %v3324_v15 }
0x1409   :  { %v2195_v16 = vmul.f32 %v3309_v14, %v3301_v52 }
0x140a   :  { %3128 = vmatmul.mubr.msk.bf16.vlgmr.msra.gmra.mrb[68].mxu1 %vm161_vm2, %v2198_v55 }
0x140b   :  { %3138 = vmatpush3.bf16.msra.mxu1 %v2351_v17  ;;  %v2199_v18 = vpack.c.bf16 %v2195_v16, %v2195_v16  ;;  %3139 = vmatprep.mubr.msk.bf16.mxu1 %vm3325_vm1, %v3324_v15 }
0x140c   :  { %v3311_v38 = vpop.eup %3310  ;;  %3151 = vmatprep.subr.bf16.mxu1 %v3324_v15 }
0x140d   :  { %v2196_v19 = vmul.f32 %v3311_v38, %v3303_v47  ;;  %3134 = vmatmul.mubr.msk.bf16.vlgmr.msra.gmra.mrb[68].mxu0 %vm161_vm2, %v2199_v18 }
0x140e   :  { %3147 = vmatprep.mubr.msk.bf16.mxu0 %vm3325_vm1, %v3324_v15  ;;  %3144 = vmatpush3.bf16.msra.mxu0 %v3224_v27 }
0x140f   :  { %v2200_v60 = vpack.c.bf16 %v2196_v19, %v2196_v19  ;;  %3145 = vmatprep.subr.bf16.mxu0 %v3324_v15 }
0x1412   :  { %3140 = vmatmul.mubr.msk.bf16.vlgmr.msra.gmra.mrb[72].mxu1 %vm161_vm2, %v2200_v60  ;;  %3146 = vmatpush3.bf16.msra.mxu0 %v3225_v28  ;;  %v3227_v28 = vld [vmem:[%s4018_s5 + $0x18] sm:$0xff]  }
0x1413   :  { %3155 = vmatprep.mubr.msk.bf16.mxu1 %vm3325_vm1, %v3324_v15  ;;  %3159 = vmatprep.subr.bf16.mxu0 %v3324_v15 }
0x14ab   :  { %v2243_v26 = vpop.f32.mrb[64].mxu0 }
0x14ac   :  { %v3123_v23 = vpop.f32.mrb[65].mxu0 }
0x14ad   :  { %v2246_v24 = vpop.f32.mrb[66].mxu0 }
0x14ae   :  { %v3124_v25 = vpop.f32.mrb[67].mxu0 }
0x14dd   :  { %v2291_v29 = vpop.f32.mrb[68].mxu1 }
0x14de   :  { %v3197_v30 = vpack.i.bf16 %v2291_v29, %v3873_v43  ;;  %v3129_v40 = vpop.f32.mrb[69].mxu1  ;;  %v2523_v29 = vrot.slane %v3734_v57, %v3661_v48 }
0x14df   :  { %v2294_v41 = vpop.f32.mrb[70].mxu1 }
0x14e0   :  { %v2339_v42 = vpop.f32.mrb[68].mxu0  ;;  %3198 = vrot.lane.b32.xlu1 %v3197_v30, %s3331_s0  ;;  %v3130_v44 = vpop.f32.mrb[71].mxu1 }
0x14e1   :  { %v3202_v49 = vpack.i.bf16 %v2339_v42, %v3875_v45  ;;  %v3135_v51 = vpop.f32.mrb[69].mxu0 }
0x14e2   :  { %v2342_v62 = vpop.f32.mrb[70].mxu0 }
0x14e3   :  { %v3136_v61 = vpop.f32.mrb[71].mxu0  ;;  %3203 = vrot.lane.b32.xlu0 %v3202_v49, %s3332_s13 }
0x14e5   :  { %v2387_v58 = vpop.f32.mrb[72].mxu1 }
0x14e6   :  { %v3207_v59 = vpack.i.bf16 %v2387_v58, %v3883_v7  ;;  %v3141_v43 = vpop.f32.mrb[73].mxu1 }
0x14e7   :  { %v2390_v63 = vpop.f32.mrb[74].mxu1 }
0x14e8   :  { %3208 = vrot.lane.b32.xlu1 %v3207_v59, %s3333_s14  ;;  %v3142_v0 = vpop.f32.mrb[75].mxu1 }
0x1552   :  { %v3199_v1 = vpop.permute.xlu1 %3198 }
0x1553   :  { %v3201_v52 = vunpack.i.h.bf16 %v3199_v1  ;;  %v3200_v3 = vunpack.i.l.bf16 %v3199_v1 }
0x1555   :  { %v3204_v2 = vpop.permute.xlu0 %3203  ;;  %v2405_v5 = vsel %vm161_vm2, %v2243_v26, %v3201_v52  ;;  %v1939_v31 = vsel %vm161_vm2, %v3871_v39, %v3200_v3  ;;  %v3945_v39 = vld [vmem:[%s4017_s7 + $0x8] sm:$0x3f]  ;;  %v3231_v52 = vld [vmem:[%s4019_s6 + $0x38] sm:$0xff]  }
0x1556   :  { %v3206_v47 = vunpack.i.h.bf16 %v3204_v2  ;;  %v3205_v4 = vunpack.i.l.bf16 %v3204_v2  ;;  %v2417_v6 = vrot.slane %v3945_v39, %v3427_v36  ;;  %v2505_v51 = vrot.slane %v3945_v39, %v3661_v48  ;;  %v3228_v2 = vld [vmem:[%s4019_s6 + $0x20] sm:$0xff]   ;;  %v3229_v48 = vld [vmem:[%s4019_s6 + $0x28] sm:$0xff]  }
0x1557   :  { %v2511_v57 = vrot.slane %v3945_v39, %v1193_v37  ;;  %v3230_v37 = vld [vmem:[%s4019_s6 + $0x30] sm:$0xff]  }
0x1558   :  { %v1940_v7 = vsel %vm621_vm4, %v1939_v31, %v3205_v4  ;;  %v2406_v8 = vsel %vm621_vm4, %v2405_v5, %v3206_v47 }
0x155a   :  { %v3209_v45 = vpop.permute.xlu1 %3208 }
0x155b   :  { %v3211_v53 = vunpack.i.h.bf16 %v3209_v45  ;;  %v3210_v50 = vunpack.i.l.bf16 %v3209_v45 }
0x155d   :  { %v2407_v9 = vsel %vm623_vm5, %v2406_v8, %v3211_v53  ;;  %v1941_v46 = vsel %vm623_vm5, %v1940_v7, %v3210_v50 }
0x155e   :  { %v2408_v10 = vpack.c.bf16 %v2407_v9, %v1941_v46 }
0x1560   :  { %3148 = vmatmul.mubr.msk.bf16.vlgmr.msra.gmra.mrb[72].mxu0 %vm38_vm0, %v2408_v10 }
0x1561   :  { %3167 = vmatprep.mubr.msk.bf16.mxu0 %vm3325_vm1, %v3324_v15  ;;  %3160 = vmatpush3.bf16.msra.mxu0 %v3228_v2 }
0x1562   :  { %3161 = vmatprep.subr.bf16.mxu0 %v3324_v15 }
0x1565   :  { %3162 = vmatpush3.bf16.msra.mxu0 %v3229_v48 }
0x1566   :  { %3163 = vmatprep.subr.bf16.mxu0 %v3324_v15 }
0x1569   :  { %3164 = vmatpush3.bf16.msra.mxu0 %v3230_v37 }
0x156a   :  { %3165 = vmatprep.subr.bf16.mxu0 %v3324_v15 }
0x156d   :  { %3166 = vmatpush3.bf16.msra.mxu0 %v3231_v52 }
0x1633   :  { %v2467_v32 = vpop.f32.mrb[72].mxu0 }
0x1634   :  { %v2468_v54 = vadd.f32 %v2467_v32, %v2417_v6  ;;  %v3149_v11 = vpop.f32.mrb[73].mxu0 }
0x1635   :  { %v2470_v12 = vpop.f32.mrb[74].mxu0 }
0x1636   :  { %v2471_v13 = vadd.f32 %v2470_v12, %v2417_v6  ;;  %v3150_v55 = vpop.f32.mrb[75].mxu0  ;;  %v2474_v14 = vadd.f32 %v2468_v54, %v3722_v33 }
0x1637   :  { %v2609_v55 = vrot.slane %v3945_v39, %v1289_v56 }
0x1638   :  { %v2476_v16 = vsel %vm38_vm0, %v2474_v14, 0.0  ;;  %v2475_v17 = vadd.f32 %v2471_v13, %v3724_v34  ;;  %v3226_v34 = vld [vmem:[%s4018_s5 + $0x10] sm:$0xff]  }
0x1639   :  { %2477 = vadd.xlane.f32.xlu0 %v2476_v16  ;;  %3152 = vmatpush3.bf16.msra.mxu1 %v3226_v34 }
0x163a   :  { %v2479_v18 = vsel %vm38_vm0, %v2475_v17, 0.0  ;;  %3153 = vmatprep.subr.bf16.mxu1 %v3324_v15 }
0x163b   :  { %2480 = vadd.xlane.f32.xlu1 %v2479_v18 }
0x163d   :  { %3154 = vmatpush3.bf16.msra.mxu1 %v3227_v28 }
0x164c   :  { %2538 = vrot.lane.b32.xlu1 %v2523_v29, %s3334_s20 }
0x16c6   :  { %v2478_v38 = vpop.xlane.xlu0 %2477 }
0x16c7   :  { %v2482_v19 = vmul.f32 0.03125, %v2478_v38 }
0x16c8   :  { %v2481_v60 = vpop.xlane.xlu1 %2480 }
0x16c9   :  { %v2484_v36 = vsub.f32 %v2474_v14, %v2482_v19  ;;  %v2483_v26 = vmul.f32 0.03125, %v2481_v60 }
0x16cb   :  { %v2485_v23 = vsub.f32 %v2475_v17, %v2483_v26  ;;  %v2486_v24 = vmul.f32 %v2484_v36, %v2484_v36 }
0x16cc   :  { %v2539_v47 = vpop.permute.xlu1 %2538 }
0x16cd   :  { %v2488_v25 = vsel %vm38_vm0, %v2486_v24, 0.0  ;;  %v2487_v27 = vmul.f32 %v2485_v23, %v2485_v23 }
0x16ce   :  { %2489 = vadd.xlane.f32.xlu0 %v2488_v25 }
0x16cf   :  { %v2491_v33 = vsel %vm38_vm0, %v2487_v27, 0.0 }
0x16d2   :  { %2492 = vadd.xlane.f32.xlu0 %v2491_v33 }
0x16e8   :  { %2536 = vrot.lane.b32.xlu0 %v3738_v22, %s3334_s20 }
0x175b   :  { %v2490_v30 = vpop.xlane.xlu0 %2489 }
0x175c   :  { %v2494_v40 = vmul.f32 0.03125, %v2490_v30 }
0x175e   :  { %v2496_v22 = vadd.f32 1e-12, %v2494_v40 }
0x175f   :  { %v2493_v41 = vpop.xlane.xlu0 %2492 }
0x1760   :  { %3312 = vrsqrt.f32 %v2496_v22  ;;  %v2495_v42 = vmul.f32 0.03125, %v2493_v41 }
0x1762   :  { %v2497_v44 = vadd.f32 1e-12, %v2495_v42 }
0x1763   :  { %v2537_v3 = vpop.permute.xlu0 %2536 }
0x1764   :  { %3314 = vrsqrt.f32 %v2497_v44  ;;  %v2540_v4 = vsel %vm38_vm0, %v2537_v3, %v2539_v47 }
0x176a   :  { %v3313_v49 = vpop.eup %3312 }
0x176b   :  { %v2500_v62 = vmul.f32 %v3313_v49, %v2484_v36 }
0x176d   :  { %v2506_v58 = vmul.f32 %v2505_v51, %v2500_v62  ;;  %v2709_v62 = vrot.slane %v3945_v39, %v1390_v20 }
0x176e   :  { %v3315_v61 = vpop.eup %3314 }
0x176f   :  { %v2501_v59 = vmul.f32 %v3315_v61, %v2485_v23  ;;  %v2512_v63 = vadd.f32 %v2511_v57, %v2506_v58  ;;  %v2715_v58 = vrot.slane %v3945_v39, %v1396_v21 }
0x1771   :  { %v2507_v43 = vmul.f32 %v2505_v51, %v2501_v59 }
0x1773   :  { %v2513_v0 = vadd.f32 %v2511_v57, %v2507_v43 }
0x1775   :  { %v2514_v1 = vpack.c.bf16 %v2513_v0, %v2512_v63 }
0x1777   :  { %3156 = vmatmul.mubr.msk.bf16.vlgmr.msra.gmra.mrb[76].mxu1 %vm38_vm0, %v2514_v1 }
0x184a   :  { %v2579_v45 = vpop.f32.mrb[76].mxu1 }
0x184b   :  { %v2580_v5 = vadd.f32 %v2579_v45, %v2540_v4  ;;  %v3157_v31 = vpop.f32.mrb[77].mxu1 }
0x184c   :  { %v2582_v53 = vpop.f32.mrb[78].mxu1 }
0x184d   :  { %v2588_v50 = vmul.f32 0.70710677, %v2580_v5  ;;  %v2583_v7 = vadd.f32 %v2582_v53, %v2540_v4  ;;  %v3158_v8 = vpop.f32.mrb[79].mxu1  ;;  %v2586_v6 = vmul.f32 0.5, %v2580_v5 }
0x184f   :  { %3316 = verf.f32 %v2588_v50  ;;  %v2589_v9 = vmul.f32 0.70710677, %v2583_v7  ;;  %v2587_v32 = vmul.f32 0.5, %v2583_v7 }
0x1851   :  { %3318 = verf.f32 %v2589_v9 }
0x1859   :  { %v3317_v15 = vpop.eup %3316 }
0x185a   :  { %v2592_v46 = vadd.f32 1.0, %v3317_v15 }
0x185b   :  { %v3319_v10 = vpop.eup %3318 }
0x185c   :  { %v2593_v54 = vadd.f32 1.0, %v3319_v10  ;;  %v2594_v11 = vmul.f32 %v2592_v46, %v2586_v6 }
0x185e   :  { %v2595_v12 = vmul.f32 %v2593_v54, %v2587_v32 }
0x1860   :  { %v2596_v13 = vpack.c.bf16 %v2595_v12, %v2594_v11 }
0x1862   :  { %3168 = vmatmul.mubr.msk.bf16.vlgmr.msra.gmra.mrb[76].mxu0 %vm1315_vm6, %v2596_v13 }
0x1935   :  { %v2671_v14 = vpop.f32.mrb[76].mxu0 }
0x1936   :  { %v2672_v16 = vadd.f32 %v2671_v14, %v2609_v55  ;;  %v3169_v17 = vpop.f32.mrb[77].mxu0 }
0x1937   :  { %v2674_v18 = vpop.f32.mrb[78].mxu0 }
0x1938   :  { %v2675_v38 = vadd.f32 %v2674_v18, %v2609_v55  ;;  %v3170_v19 = vpop.f32.mrb[79].mxu0  ;;  %v2678_v60 = vadd.f32 %v2672_v16, %v2512_v63 }
0x193a   :  { %v2680_v36 = vsel %vm38_vm0, %v2678_v60, 0.0  ;;  %v2679_v26 = vadd.f32 %v2675_v38, %v2513_v0 }
0x193b   :  { %2681 = vadd.xlane.f32.xlu1 %v2680_v36 }
0x193c   :  { %v2683_v23 = vsel %vm38_vm0, %v2679_v26, 0.0 }
0x193d   :  { %2684 = vadd.xlane.f32.xlu0 %v2683_v23 }
0x19c8   :  { %v2682_v24 = vpop.xlane.xlu1 %2681 }
0x19c9   :  { %v2686_v25 = vmul.f32 0.03125, %v2682_v24 }
0x19ca   :  { %v2685_v27 = vpop.xlane.xlu0 %2684 }
0x19cb   :  { %v2688_v33 = vsub.f32 %v2678_v60, %v2686_v25  ;;  %v2687_v34 = vmul.f32 0.03125, %v2685_v27 }
0x19cd   :  { %v2689_v56 = vsub.f32 %v2679_v26, %v2687_v34  ;;  %v2690_v28 = vmul.f32 %v2688_v33, %v2688_v33 }
0x19cf   :  { %v2692_v29 = vsel %vm38_vm0, %v2690_v28, 0.0  ;;  %v2691_v30 = vmul.f32 %v2689_v56, %v2689_v56 }
0x19d0   :  { %2693 = vadd.xlane.f32.xlu0 %v2692_v29 }
0x19d1   :  { %v2695_v40 = vsel %vm38_vm0, %v2691_v30, 0.0 }
0x19d2   :  { %2696 = vadd.xlane.f32.xlu1 %v2695_v40 }
0x1a5d   :  { %v2694_v22 = vpop.xlane.xlu0 %2693 }
0x1a5e   :  { %v2698_v41 = vmul.f32 0.03125, %v2694_v22 }
0x1a5f   :  { %v2697_v42 = vpop.xlane.xlu1 %2696 }
0x1a60   :  { %v2700_v44 = vadd.f32 1e-12, %v2698_v41  ;;  %v2699_v49 = vmul.f32 0.03125, %v2697_v42 }
0x1a62   :  { %3320 = vrsqrt.f32 %v2700_v44  ;;  %v2701_v51 = vadd.f32 1e-12, %v2699_v49 }
0x1a64   :  { %3322 = vrsqrt.f32 %v2701_v51 }
0x1a6c   :  { %v3321_v61 = vpop.eup %3320 }
0x1a6d   :  { %v2704_v59 = vmul.f32 %v3321_v61, %v2688_v33 }
0x1a6e   :  { %v3323_v57 = vpop.eup %3322 }
0x1a6f   :  { %v2710_v43 = vmul.f32 %v2709_v62, %v2704_v59  ;;  %v2705_v63 = vmul.f32 %v3323_v57, %v2689_v56 }
0x1a71   :  { %v2716_v0 = vadd.f32 %v2715_v58, %v2710_v43  ;;  %v2711_v1 = vmul.f32 %v2709_v62, %v2705_v63 }
0x1a73   :  { %2718 = vst.msk [vmem:[%s4020_s9] sm:$0xff] %vm38_vm0, %v2716_v0  ;;  %v2717_v2 = vadd.f32 %v2715_v58, %v2711_v1 }
0x1a75   :  { %2719 = vst.msk [vmem:[%s4020_s9 + $0x8] sm:$0xff] %vm38_vm0, %v2717_v2 }

</bundles_post_ra>
